<compile_context>
chip_gen: v6e
topology: v6e:2x2x1
jax: 0.10.0
libtpu: 0.0.40
codegen_flags: <defaults>
</compile_context>

<pallas_src>
import jax
import jax.numpy as jnp
from jax.experimental import pallas as pl
from jax.experimental.pallas import tpu as pltpu

BN_EPS = 1e-5


# ---------------------------------------------------------------------------
# Fused kernel: grid axis = GNN layer; h, v live in VMEM scratch
# ---------------------------------------------------------------------------
def gnn_fused_kernel(x_ref, adj_ref, st_ref, s_ref, invcnt_ref,
                     ebias_ref, eps1p_ref,
                     w1_ref, b1_ref, w2_ref, b2_ref,
                     vw1_ref, vb1_ref, vw2_ref, vb2_ref,
                     pw_ref, pb_ref,
                     out_ref,
                     h_sc, v_sc):
    l = pl.program_id(0)
    is_last = l == pl.num_programs(0) - 1

    @pl.when(l == 0)
    def _():
        h_sc[...] = x_ref[...]                      # AtomEncoder stand-in
        v_sc[...] = jnp.zeros_like(v_sc)            # virtual-node init = 0

    h = h_sc[...]
    v = v_sc[...]

    def bdot(a, b):
        # bf16 MXU operands, f32 accumulation.
        return jnp.dot(a.astype(jnp.bfloat16), b.astype(jnp.bfloat16),
                       preferred_element_type=jnp.float32)

    # broadcast virtual-node embedding to its nodes: St @ v (single small MXU op)
    h_aug = h + bdot(st_ref[...], v)

    # GIN message passing: sum_j relu(h_aug_j + edge_bias)  (bf16 MXU)
    msg = bdot(adj_ref[...], jnp.maximum(h_aug + ebias_ref[...], 0.0))
    z = eps1p_ref[...] * h_aug + msg                # (1 + eps) * h_aug + msg

    # GIN MLP with BatchNorm (eval) folded into the Linear weights/biases
    t = jnp.maximum(bdot(z, w1_ref[...]) + b1_ref[...], 0.0)
    h_bn = bdot(t, w2_ref[...]) + b2_ref[...]

    # not-last layer: ReLU, store h, and update the virtual node
    @pl.when(jnp.logical_not(is_last))
    def _():
        h_sc[...] = jnp.maximum(h_bn, 0.0)          # dropout = identity (eval)
        pooled = bdot(s_ref[...], h_aug) + v        # global_add_pool + old v
        tv = jnp.maximum(bdot(pooled, vw1_ref[...]) + vb1_ref[...], 0.0)
        v_sc[...] = jnp.maximum(bdot(tv, vw2_ref[...]) + vb2_ref[...], 0.0)

    # last layer: no ReLU; global_mean_pool + graph_pred_linear
    @pl.when(is_last)
    def _():
        hg = bdot(s_ref[...], h_bn) * invcnt_ref[...]
        out_ref[...] = bdot(hg, pw_ref[...]) + pb_ref[...]


# ---------------------------------------------------------------------------
# Wrapper: one pallas_call for the whole network
# ---------------------------------------------------------------------------
def gnn_forward(params, x, adj, St, counts):
    N, D = x.shape
    G = St.shape[1]
    L, _, H = params["w1"].shape
    C = params["pred_w"].shape[1]
    bf = jnp.bfloat16

    S = St.T                                              # [G, N] for pooling
    invcnt = (1.0 / counts).astype(jnp.float32)[:, None]  # [G, 1]

    def const(*shape):
        # Block index never changes across the layer grid -> fetched once.
        # (pl.Buffered(1) would also halve its VMEM residency; omitted here
        #  since it is negligible at this scale.)
        return pl.BlockSpec(shape, lambda l: (0,) * len(shape))

    def per_layer(*shape):
        return pl.BlockSpec((None,) + shape,
                            lambda l: (l,) + (0,) * len(shape))

    def per_layer_vn(*shape):
        # VN weights are never read on the last layer: clamp the index so the
        # zero-padded last entry is never DMA'd (reuses the previous block).
        return pl.BlockSpec(
            (None,) + shape,
            lambda l: (jnp.minimum(l, L - 2),) + (0,) * len(shape))

    in_specs = [
        const(N, D),          # x (f32)
        const(N, N),          # adj (bf16, exact 0/1)
        const(N, G),          # St (bf16)
        const(G, N),          # S = St^T (bf16)
        const(G, 1),          # 1 / counts (f32)
        per_layer(1, D),      # edge bias (f32)
        per_layer(1, 1),      # 1 + eps (f32)
        per_layer(D, H),      # GIN MLP w1 (bf16, BN folded)
        per_layer(1, H),      # GIN MLP b1 (f32)
        per_layer(H, D),      # GIN MLP w2 (bf16, layer-BN folded)
        per_layer(1, D),      # GIN MLP b2 (f32)
        per_layer_vn(D, H),   # VN MLP w1 (bf16)
        per_layer_vn(1, H),   # VN MLP b1 (f32)
        per_layer_vn(H, D),   # VN MLP w2 (bf16)
        per_layer_vn(1, D),   # VN MLP b2 (f32)
        const(D, C),          # graph_pred_linear weight (f32, cast at dot)
        const(1, C),          # graph_pred_linear bias (f32)
    ]

    return pl.pallas_call(
        gnn_fused_kernel,
        out_shape=jax.ShapeDtypeStruct((G, C), jnp.float32),
        grid_spec=pltpu.PrefetchScalarGridSpec(
            num_scalar_prefetch=0,
            grid=(L,),                       # sequential layer loop (1 TC; a
            in_specs=in_specs,               # node-parallel axis would be
            out_specs=pl.BlockSpec((G, C), lambda l: (0, 0)),  # needed for v7x's 2nd core)
            scratch_shapes=[pltpu.VMEM((N, D), jnp.float32),   # h (resident)
                            pltpu.VMEM((G, D), jnp.float32)],  # v (resident)
        ),
        compiler_params=pltpu.CompilerParams(
            dimension_semantics=("arbitrary",),
            vmem_limit_bytes=48 << 20),      # headroom on v7x (64 MiB physical)
    )(x, adj.astype(bf), St.astype(bf), S.astype(bf), invcnt,
      params["ebias"], params["eps1p"],
      params["w1"].astype(bf), params["b1"],
      params["w2"].astype(bf), params["b2"],
      params["vw1"].astype(bf), params["vb1"],
      params["vw2"].astype(bf), params["vb2"],
      params["pred_w"], params["pred_b"])


# ---------------------------------------------------------------------------
# Parameters (fresh-init semantics, eval mode), BN folded into Linears
# ---------------------------------------------------------------------------
def _bn_fold(dim):
    gamma = jnp.ones((dim,), jnp.float32)
    beta = jnp.zeros((dim,), jnp.float32)
    mean = jnp.zeros((dim,), jnp.float32)
    var = jnp.ones((dim,), jnp.float32)
    scale = gamma / jnp.sqrt(var + BN_EPS)
    shift = beta - mean * scale
    return scale, shift


def make_params(key, num_layer, emb_dim, num_class):
    D, H = emb_dim, 2 * emb_dim
    w1s, b1s, w2s, b2s, ebias, eps1p = [], [], [], [], [], []
    vw1s, vb1s, vw2s, vb2s = [], [], [], []
    for l in range(num_layer):
        key, k1, k2, k3 = jax.random.split(key, 4)
        w1 = 0.1 * jax.random.normal(k1, (D, H), jnp.float32)
        w2 = 0.1 * jax.random.normal(k2, (H, D), jnp.float32)
        s1, t1 = _bn_fold(H)         # BN inside the GIN MLP
        sl, tl = _bn_fold(D)         # per-layer BN after the conv
        # fold BN into adjacent Linear: (x@w)*s + t == x@(w*s) + t
        w1s.append(w1 * s1[None, :]);  b1s.append(t1[None, :])
        w2s.append(w2 * sl[None, :]);  b2s.append(tl[None, :])
        ebias.append(0.1 * jax.random.normal(k3, (1, D), jnp.float32))
        eps1p.append(jnp.ones((1, 1), jnp.float32))          # GIN eps = 0
        if l < num_layer - 1:
            key, k4, k5 = jax.random.split(key, 3)
            vw1 = 0.1 * jax.random.normal(k4, (D, H), jnp.float32)
            vw2 = 0.1 * jax.random.normal(k5, (H, D), jnp.float32)
            vs1, vt1 = _bn_fold(H)
            vs2, vt2 = _bn_fold(D)
            vw1s.append(vw1 * vs1[None, :]); vb1s.append(vt1[None, :])
            vw2s.append(vw2 * vs2[None, :]); vb2s.append(vt2[None, :])
        else:   # padding entry so VN params stack to [L, ...] (never fetched)
            vw1s.append(jnp.zeros((D, H), jnp.float32))
            vb1s.append(jnp.zeros((1, H), jnp.float32))
            vw2s.append(jnp.zeros((H, D), jnp.float32))
            vb2s.append(jnp.zeros((1, D), jnp.float32))
    key, kp = jax.random.split(key)
    return dict(
        w1=jnp.stack(w1s), b1=jnp.stack(b1s),
        w2=jnp.stack(w2s), b2=jnp.stack(b2s),
        ebias=jnp.stack(ebias), eps1p=jnp.stack(eps1p),
        vw1=jnp.stack(vw1s), vb1=jnp.stack(vb1s),
        vw2=jnp.stack(vw2s), vb2=jnp.stack(vb2s),
        pred_w=0.1 * jax.random.normal(kp, (D, num_class), jnp.float32),
        pred_b=jnp.zeros((1, num_class), jnp.float32),
    )


# ---------------------------------------------------------------------------
# Pure-JAX reference (same bf16 dot operands as the kernel) for a sanity check
# ---------------------------------------------------------------------------
def _bdot(a, b):
    return jnp.dot(a.astype(jnp.bfloat16), b.astype(jnp.bfloat16),
                   preferred_element_type=jnp.float32)


def gnn_reference(params, x, adj, St, counts):
    L = params["w1"].shape[0]
    G = St.shape[1]
    S = St.T
    h = x
    v = jnp.zeros((G, x.shape[1]), jnp.float32)
    for l in range(L):
        h_aug = h + _bdot(St, v)
        msg = _bdot(adj, jnp.maximum(h_aug + params["ebias"][l], 0.0))
        z = params["eps1p"][l] * h_aug + msg
        t = jnp.maximum(_bdot(z, params["w1"][l]) + params["b1"][l], 0.0)
        h_bn = _bdot(t, params["w2"][l]) + params["b2"][l]
        if l < L - 1:
            h = jnp.maximum(h_bn, 0.0)
            pooled = _bdot(S, h_aug) + v
            tv = jnp.maximum(_bdot(pooled, params["vw1"][l]) + params["vb1"][l], 0.0)
            v = jnp.maximum(_bdot(tv, params["vw2"][l]) + params["vb2"][l], 0.0)
        else:
            h = h_bn
    hg = _bdot(S, h) * (1.0 / counts)[:, None]
    return _bdot(hg, params["pred_w"]) + params["pred_b"]


# ---------------------------------------------------------------------------
if __name__ == "__main__":
    NUM_NODES = 32      # total nodes in the batched graph
    EMB_DIM = 128       # emb_dim (multiple of 128 -> lane-dense)
    NUM_GRAPHS = 2      # graphs in the batch
    NUM_CLASS = 4       # num_class
    NUM_LAYER = 3       # num_layer (>= 2)

    key = jax.random.PRNGKey(0)
    key, kx, ka = jax.random.split(key, 3)

    # node -> graph assignment: first 20 nodes -> graph 0, last 12 -> graph 1
    batch_vec = jnp.concatenate([jnp.zeros((20,), jnp.int32),
                                 jnp.ones((12,), jnp.int32)])
    S = jax.nn.one_hot(batch_vec, NUM_GRAPHS, dtype=jnp.float32).T   # [G, N]
    St = S.T                                                         # [N, G]
    counts = jnp.sum(S, axis=1)                                      # [G]

    # node features (stand-in for AtomEncoder output)
    x = jax.random.normal(kx, (NUM_NODES, EMB_DIM), jnp.float32)

    # random symmetric adjacency, block-diagonal per graph, no self loops
    a = (jax.random.uniform(ka, (NUM_NODES, NUM_NODES)) < 0.3).astype(jnp.float32)
    adj = jnp.maximum(a, a.T)
    adj = adj * (St @ S) * (1.0 - jnp.eye(NUM_NODES, dtype=jnp.float32))

    params = make_params(key, NUM_LAYER, EMB_DIM, NUM_CLASS)

    logits = gnn_forward(params, x, adj, St, counts)
    logits = jax.block_until_ready(logits)
    ref = gnn_reference(params, x, adj, St, counts)

    assert logits.shape == (NUM_GRAPHS, NUM_CLASS)
    assert bool(jnp.all(jnp.isfinite(logits)))
    assert bool(jnp.allclose(logits, ref, atol=1e-2, rtol=1e-2))
    print("KERNEL_OK")
</pallas_src>

<mosaic_0001>
module attributes {stable_mosaic.version = 11 : i64} {
  func.func @gnn_fused_kernel(%arg0: i32, %arg1: memref<32x128xf32, #tpu.memory_space<vmem>>, %arg2: memref<32x32xbf16, #tpu.memory_space<vmem>>, %arg3: memref<32x2xbf16, #tpu.memory_space<vmem>>, %arg4: memref<2x32xbf16, #tpu.memory_space<vmem>>, %arg5: memref<2x1xf32, #tpu.memory_space<vmem>>, %arg6: memref<1x1x128xf32, #tpu.memory_space<vmem>>, %arg7: memref<1x1x1xf32, #tpu.memory_space<vmem>>, %arg8: memref<1x128x256xbf16, #tpu.memory_space<vmem>>, %arg9: memref<1x1x256xf32, #tpu.memory_space<vmem>>, %arg10: memref<1x256x128xbf16, #tpu.memory_space<vmem>>, %arg11: memref<1x1x128xf32, #tpu.memory_space<vmem>>, %arg12: memref<1x128x256xbf16, #tpu.memory_space<vmem>>, %arg13: memref<1x1x256xf32, #tpu.memory_space<vmem>>, %arg14: memref<1x256x128xbf16, #tpu.memory_space<vmem>>, %arg15: memref<1x1x128xf32, #tpu.memory_space<vmem>>, %arg16: memref<128x4xf32, #tpu.memory_space<vmem>>, %arg17: memref<1x4xf32, #tpu.memory_space<vmem>>, %arg18: memref<2x4xf32, #tpu.memory_space<vmem>>, %arg19: memref<32x128xf32, #tpu.memory_space<vmem>>, %arg20: memref<2x128xf32, #tpu.memory_space<vmem>>) attributes {dimension_semantics = [#tpu.dimension_semantics<arbitrary>], iteration_bounds = array<i64: 3>, scalar_prefetch = 0 : i64, scratch_operands = 2 : i64, tpu.core_type = #tpu.core_type<tc>, window_params = [{pipeline_mode = #tpu.pipeline_mode<synchronous>, transform_indices = @transform_0, window_bounds = array<i64: 32, 128>}, {pipeline_mode = #tpu.pipeline_mode<synchronous>, transform_indices = @transform_1, window_bounds = array<i64: 32, 32>}, {pipeline_mode = #tpu.pipeline_mode<synchronous>, transform_indices = @transform_2, window_bounds = array<i64: 32, 2>}, {pipeline_mode = #tpu.pipeline_mode<synchronous>, transform_indices = @transform_3, window_bounds = array<i64: 2, 32>}, {pipeline_mode = #tpu.pipeline_mode<synchronous>, transform_indices = @transform_4, window_bounds = array<i64: 2, 1>}, {transform_indices = @transform_5, window_bounds = array<i64: 1, 1, 128>}, {transform_indices = @transform_6, window_bounds = array<i64: 1, 1, 1>}, {transform_indices = @transform_7, window_bounds = array<i64: 1, 128, 256>}, {transform_indices = @transform_8, window_bounds = array<i64: 1, 1, 256>}, {transform_indices = @transform_9, window_bounds = array<i64: 1, 256, 128>}, {transform_indices = @transform_10, window_bounds = array<i64: 1, 1, 128>}, {transform_indices = @transform_11, window_bounds = array<i64: 1, 128, 256>}, {transform_indices = @transform_12, window_bounds = array<i64: 1, 1, 256>}, {transform_indices = @transform_13, window_bounds = array<i64: 1, 256, 128>}, {transform_indices = @transform_14, window_bounds = array<i64: 1, 1, 128>}, {pipeline_mode = #tpu.pipeline_mode<synchronous>, transform_indices = @transform_15, window_bounds = array<i64: 128, 4>}, {pipeline_mode = #tpu.pipeline_mode<synchronous>, transform_indices = @transform_16, window_bounds = array<i64: 1, 4>}, {pipeline_mode = #tpu.pipeline_mode<synchronous>, transform_indices = @transform_17, window_bounds = array<i64: 2, 4>}]} {
    %c2_i32 = arith.constant 2 : i32
    %0 = arith.cmpi eq, %arg0, %c2_i32 : i32
    %c0_i32 = arith.constant 0 : i32
    %1 = arith.cmpi eq, %arg0, %c0_i32 : i32
    %2 = arith.extui %1 : i1 to i32
    %c0_i32_0 = arith.constant 0 : i32
    %3 = arith.cmpi ne, %2, %c0_i32_0 : i32
    scf.if %3 {
      %c0_33 = arith.constant 0 : index
      %c0_34 = arith.constant 0 : index
      %47 = vector.load %arg1[%c0_33, %c0_34] : memref<32x128xf32, #tpu.memory_space<vmem>>, vector<32x128xf32>
      %c0_35 = arith.constant 0 : index
      %c0_36 = arith.constant 0 : index
      %48 = vector.load %arg19[%c0_35, %c0_36] : memref<32x128xf32, #tpu.memory_space<vmem>>, vector<32x128xf32>
      tpu.vector_store %arg19[%c0_35, %c0_36], %47 {strides = array<i32>} : memref<32x128xf32, #tpu.memory_space<vmem>>, vector<32x128xf32>,
      %cst_37 = arith.constant 0.000000e+00 : f32
      %49 = vector.broadcast %cst_37 : f32 to vector<2x128xf32>
      %c0_38 = arith.constant 0 : index
      %c0_39 = arith.constant 0 : index
      %50 = vector.load %arg20[%c0_38, %c0_39] : memref<2x128xf32, #tpu.memory_space<vmem>>, vector<2x128xf32>
      tpu.vector_store %arg20[%c0_38, %c0_39], %49 {strides = array<i32>} : memref<2x128xf32, #tpu.memory_space<vmem>>, vector<2x128xf32>,
    } else {
    }
    %c0 = arith.constant 0 : index
    %c0_1 = arith.constant 0 : index
    %4 = vector.load %arg19[%c0, %c0_1] : memref<32x128xf32, #tpu.memory_space<vmem>>, vector<32x128xf32>
    %c0_2 = arith.constant 0 : index
    %c0_3 = arith.constant 0 : index
    %5 = vector.load %arg20[%c0_2, %c0_3] : memref<2x128xf32, #tpu.memory_space<vmem>>, vector<2x128xf32>
    %c0_4 = arith.constant 0 : index
    %c0_5 = arith.constant 0 : index
    %6 = vector.load %arg3[%c0_4, %c0_5] : memref<32x2xbf16, #tpu.memory_space<vmem>>, vector<32x2xbf16>
    %7 = arith.truncf %5 : vector<2x128xf32> to vector<2x128xbf16>
    %cst = arith.constant dense<0.000000e+00> : vector<32x128xf32>
    %8 = tpu.matmul %6, %7, %cst {dimension_numbers = #tpu.dot_dimension_numbers<[1], [0], [0], [1], [0, 0, 1, 1], [], []>} : vector<32x2xbf16>, vector<2x128xbf16>, vector<32x128xf32> -> vector<32x128xf32>
    %9 = arith.addf %4, %8 : vector<32x128xf32>
    %c0_6 = arith.constant 0 : index
    %c0_7 = arith.constant 0 : index
    %10 = vector.load %arg2[%c0_6, %c0_7] : memref<32x32xbf16, #tpu.memory_space<vmem>>, vector<32x32xbf16>
    %c0_8 = arith.constant 0 : index
    %c0_9 = arith.constant 0 : index
    %c0_10 = arith.constant 0 : index
    %11 = vector.load %arg6[%c0_8, %c0_9, %c0_10] : memref<1x1x128xf32, #tpu.memory_space<vmem>>, vector<1x1x128xf32>
    %12 = vector.shape_cast %11 : vector<1x1x128xf32> to vector<1x128xf32>
    %13 = vector.broadcast %12 : vector<1x128xf32> to vector<32x128xf32>
    %14 = arith.addf %9, %13 : vector<32x128xf32>
    %cst_11 = arith.constant 0.000000e+00 : f32
    %15 = vector.broadcast %cst_11 : f32 to vector<32x128xf32>
    %16 = arith.maximumf %14, %15 : vector<32x128xf32>
    %17 = arith.truncf %16 : vector<32x128xf32> to vector<32x128xbf16>
    %cst_12 = arith.constant dense<0.000000e+00> : vector<32x128xf32>
    %18 = tpu.matmul %10, %17, %cst_12 {dimension_numbers = #tpu.dot_dimension_numbers<[1], [0], [0], [1], [0, 0, 1, 1], [], []>} : vector<32x32xbf16>, vector<32x128xbf16>, vector<32x128xf32> -> vector<32x128xf32>
    %c0_13 = arith.constant 0 : index
    %c0_14 = arith.constant 0 : index
    %c0_15 = arith.constant 0 : index
    %19 = vector.load %arg7[%c0_13, %c0_14, %c0_15] : memref<1x1x1xf32, #tpu.memory_space<vmem>>, vector<1x1x1xf32>
    %20 = vector.shape_cast %19 : vector<1x1x1xf32> to vector<1x1xf32>
    %21 = vector.broadcast %20 : vector<1x1xf32> to vector<32x128xf32>
    %22 = arith.mulf %21, %9 : vector<32x128xf32>
    %23 = arith.addf %22, %18 : vector<32x128xf32>
    %c0_16 = arith.constant 0 : index
    %c0_17 = arith.constant 0 : index
    %c0_18 = arith.constant 0 : index
    %24 = vector.load %arg8[%c0_16, %c0_17, %c0_18] : memref<1x128x256xbf16, #tpu.memory_space<vmem>>, vector<1x128x256xbf16>
    %25 = vector.shape_cast %24 : vector<1x128x256xbf16> to vector<128x256xbf16>
    %26 = arith.truncf %23 : vector<32x128xf32> to vector<32x128xbf16>
    %cst_19 = arith.constant dense<0.000000e+00> : vector<32x256xf32>
    %27 = tpu.matmul %26, %25, %cst_19 {dimension_numbers = #tpu.dot_dimension_numbers<[1], [0], [0], [1], [0, 0, 1, 1], [], []>} : vector<32x128xbf16>, vector<128x256xbf16>, vector<32x256xf32> -> vector<32x256xf32>
    %c0_20 = arith.constant 0 : index
    %c0_21 = arith.constant 0 : index
    %c0_22 = arith.constant 0 : index
    %28 = vector.load %arg9[%c0_20, %c0_21, %c0_22] : memref<1x1x256xf32, #tpu.memory_space<vmem>>, vector<1x1x256xf32>
    %29 = vector.shape_cast %28 : vector<1x1x256xf32> to vector<1x256xf32>
    %30 = vector.broadcast %29 : vector<1x256xf32> to vector<32x256xf32>
    %31 = arith.addf %27, %30 : vector<32x256xf32>
    %cst_23 = arith.constant 0.000000e+00 : f32
    %32 = vector.broadcast %cst_23 : f32 to vector<32x256xf32>
    %33 = arith.maximumf %31, %32 : vector<32x256xf32>
    %c0_24 = arith.constant 0 : index
    %c0_25 = arith.constant 0 : index
    %c0_26 = arith.constant 0 : index
    %34 = vector.load %arg10[%c0_24, %c0_25, %c0_26] : memref<1x256x128xbf16, #tpu.memory_space<vmem>>, vector<1x256x128xbf16>
    %35 = vector.shape_cast %34 : vector<1x256x128xbf16> to vector<256x128xbf16>
    %36 = arith.truncf %33 : vector<32x256xf32> to vector<32x256xbf16>
    %cst_27 = arith.constant dense<0.000000e+00> : vector<32x128xf32>
    %37 = tpu.matmul %36, %35, %cst_27 {dimension_numbers = #tpu.dot_dimension_numbers<[1], [0], [0], [1], [0, 0, 1, 1], [], []>} : vector<32x256xbf16>, vector<256x128xbf16>, vector<32x128xf32> -> vector<32x128xf32>
    %c0_28 = arith.constant 0 : index
    %c0_29 = arith.constant 0 : index
    %c0_30 = arith.constant 0 : index
    %38 = vector.load %arg11[%c0_28, %c0_29, %c0_30] : memref<1x1x128xf32, #tpu.memory_space<vmem>>, vector<1x1x128xf32>
    %39 = vector.shape_cast %38 : vector<1x1x128xf32> to vector<1x128xf32>
    %40 = vector.broadcast %39 : vector<1x128xf32> to vector<32x128xf32>
    %41 = arith.addf %37, %40 : vector<32x128xf32>
    %true = arith.constant true
    %42 = arith.xori %0, %true : i1
    %43 = arith.extui %42 : i1 to i32
    %c0_i32_31 = arith.constant 0 : i32
    %44 = arith.cmpi ne, %43, %c0_i32_31 : i32
    scf.if %44 {
      %cst_33 = arith.constant 0.000000e+00 : f32
      %47 = vector.broadcast %cst_33 : f32 to vector<32x128xf32>
      %48 = arith.maximumf %41, %47 : vector<32x128xf32>
      %c0_34 = arith.constant 0 : index
      %c0_35 = arith.constant 0 : index
      %49 = vector.load %arg19[%c0_34, %c0_35] : memref<32x128xf32, #tpu.memory_space<vmem>>, vector<32x128xf32>
      tpu.vector_store %arg19[%c0_34, %c0_35], %48 {strides = array<i32>} : memref<32x128xf32, #tpu.memory_space<vmem>>, vector<32x128xf32>,
      %c0_36 = arith.constant 0 : index
      %c0_37 = arith.constant 0 : index
      %50 = vector.load %arg4[%c0_36, %c0_37] : memref<2x32xbf16, #tpu.memory_space<vmem>>, vector<2x32xbf16>
      %51 = arith.truncf %9 : vector<32x128xf32> to vector<32x128xbf16>
      %cst_38 = arith.constant dense<0.000000e+00> : vector<2x128xf32>
      %52 = tpu.matmul %50, %51, %cst_38 {dimension_numbers = #tpu.dot_dimension_numbers<[1], [0], [0], [1], [0, 0, 1, 1], [], []>} : vector<2x32xbf16>, vector<32x128xbf16>, vector<2x128xf32> -> vector<2x128xf32>
      %53 = arith.addf %52, %5 : vector<2x128xf32>
      %c0_39 = arith.constant 0 : index
      %c0_40 = arith.constant 0 : index
      %c0_41 = arith.constant 0 : index
      %54 = vector.load %arg12[%c0_39, %c0_40, %c0_41] : memref<1x128x256xbf16, #tpu.memory_space<vmem>>, vector<1x128x256xbf16>
      %55 = vector.shape_cast %54 : vector<1x128x256xbf16> to vector<128x256xbf16>
      %56 = arith.truncf %53 : vector<2x128xf32> to vector<2x128xbf16>
      %cst_42 = arith.constant dense<0.000000e+00> : vector<2x256xf32>
      %57 = tpu.matmul %56, %55, %cst_42 {dimension_numbers = #tpu.dot_dimension_numbers<[1], [0], [0], [1], [0, 0, 1, 1], [], []>} : vector<2x128xbf16>, vector<128x256xbf16>, vector<2x256xf32> -> vector<2x256xf32>
      %c0_43 = arith.constant 0 : index
      %c0_44 = arith.constant 0 : index
      %c0_45 = arith.constant 0 : index
      %58 = vector.load %arg13[%c0_43, %c0_44, %c0_45] : memref<1x1x256xf32, #tpu.memory_space<vmem>>, vector<1x1x256xf32>
      %59 = vector.shape_cast %58 : vector<1x1x256xf32> to vector<1x256xf32>
      %60 = vector.broadcast %59 : vector<1x256xf32> to vector<2x256xf32>
      %61 = arith.addf %57, %60 : vector<2x256xf32>
      %cst_46 = arith.constant 0.000000e+00 : f32
      %62 = vector.broadcast %cst_46 : f32 to vector<2x256xf32>
      %63 = arith.maximumf %61, %62 : vector<2x256xf32>
      %c0_47 = arith.constant 0 : index
      %c0_48 = arith.constant 0 : index
      %c0_49 = arith.constant 0 : index
      %64 = vector.load %arg14[%c0_47, %c0_48, %c0_49] : memref<1x256x128xbf16, #tpu.memory_space<vmem>>, vector<1x256x128xbf16>
      %65 = vector.shape_cast %64 : vector<1x256x128xbf16> to vector<256x128xbf16>
      %66 = arith.truncf %63 : vector<2x256xf32> to vector<2x256xbf16>
      %cst_50 = arith.constant dense<0.000000e+00> : vector<2x128xf32>
      %67 = tpu.matmul %66, %65, %cst_50 {dimension_numbers = #tpu.dot_dimension_numbers<[1], [0], [0], [1], [0, 0, 1, 1], [], []>} : vector<2x256xbf16>, vector<256x128xbf16>, vector<2x128xf32> -> vector<2x128xf32>
      %c0_51 = arith.constant 0 : index
      %c0_52 = arith.constant 0 : index
      %c0_53 = arith.constant 0 : index
      %68 = vector.load %arg15[%c0_51, %c0_52, %c0_53] : memref<1x1x128xf32, #tpu.memory_space<vmem>>, vector<1x1x128xf32>
      %69 = vector.shape_cast %68 : vector<1x1x128xf32> to vector<1x128xf32>
      %70 = vector.broadcast %69 : vector<1x128xf32> to vector<2x128xf32>
      %71 = arith.addf %67, %70 : vector<2x128xf32>
      %cst_54 = arith.constant 0.000000e+00 : f32
      %72 = vector.broadcast %cst_54 : f32 to vector<2x128xf32>
      %73 = arith.maximumf %71, %72 : vector<2x128xf32>
      %c0_55 = arith.constant 0 : index
      %c0_56 = arith.constant 0 : index
      %74 = vector.load %arg20[%c0_55, %c0_56] : memref<2x128xf32, #tpu.memory_space<vmem>>, vector<2x128xf32>
      tpu.vector_store %arg20[%c0_55, %c0_56], %73 {strides = array<i32>} : memref<2x128xf32, #tpu.memory_space<vmem>>, vector<2x128xf32>,
    } else {
    }
    %45 = arith.extui %0 : i1 to i32
    %c0_i32_32 = arith.constant 0 : i32
    %46 = arith.cmpi ne, %45, %c0_i32_32 : i32
    scf.if %46 {
      %c0_33 = arith.constant 0 : index
      %c0_34 = arith.constant 0 : index
      %47 = vector.load %arg4[%c0_33, %c0_34] : memref<2x32xbf16, #tpu.memory_space<vmem>>, vector<2x32xbf16>
      %48 = arith.truncf %41 : vector<32x128xf32> to vector<32x128xbf16>
      %cst_35 = arith.constant dense<0.000000e+00> : vector<2x128xf32>
      %49 = tpu.matmul %47, %48, %cst_35 {dimension_numbers = #tpu.dot_dimension_numbers<[1], [0], [0], [1], [0, 0, 1, 1], [], []>} : vector<2x32xbf16>, vector<32x128xbf16>, vector<2x128xf32> -> vector<2x128xf32>
      %c0_36 = arith.constant 0 : index
      %c0_37 = arith.constant 0 : index
      %50 = vector.load %arg5[%c0_36, %c0_37] : memref<2x1xf32, #tpu.memory_space<vmem>>, vector<2x1xf32>
      %51 = vector.broadcast %50 : vector<2x1xf32> to vector<2x128xf32>
      %52 = arith.mulf %49, %51 : vector<2x128xf32>
      %c0_38 = arith.constant 0 : index
      %c0_39 = arith.constant 0 : index
      %53 = vector.load %arg16[%c0_38, %c0_39] : memref<128x4xf32, #tpu.memory_space<vmem>>, vector<128x4xf32>
      %54 = arith.truncf %52 : vector<2x128xf32> to vector<2x128xbf16>
      %55 = arith.truncf %53 : vector<128x4xf32> to vector<128x4xbf16>
      %cst_40 = arith.constant dense<0.000000e+00> : vector<2x4xf32>
      %56 = tpu.matmul %54, %55, %cst_40 {dimension_numbers = #tpu.dot_dimension_numbers<[1], [0], [0], [1], [0, 0, 1, 1], [], []>} : vector<2x128xbf16>, vector<128x4xbf16>, vector<2x4xf32> -> vector<2x4xf32>
      %c0_41 = arith.constant 0 : index
      %c0_42 = arith.constant 0 : index
      %57 = vector.load %arg17[%c0_41, %c0_42] : memref<1x4xf32, #tpu.memory_space<vmem>>, vector<1x4xf32>
      %58 = vector.broadcast %57 : vector<1x4xf32> to vector<2x4xf32>
      %59 = arith.addf %56, %58 : vector<2x4xf32>
      %c0_43 = arith.constant 0 : index
      %c0_44 = arith.constant 0 : index
      %60 = vector.load %arg18[%c0_43, %c0_44] : memref<2x4xf32, #tpu.memory_space<vmem>>, vector<2x4xf32>
      tpu.vector_store %arg18[%c0_43, %c0_44], %59 {strides = array<i32>} : memref<2x4xf32, #tpu.memory_space<vmem>>, vector<2x4xf32>,
    } else {
    }
    return
  }
  func.func @transform_0(%arg0: i32) -> (i32, i32) {
    %c0_i32 = arith.constant 0 : i32
    %c0_i32_0 = arith.constant 0 : i32
    %c0_i32_1 = arith.constant 0 : i32
    return %c0_i32, %c0_i32_0 : i32, i32
  }
  func.func @transform_1(%arg0: i32) -> (i32, i32) {
    %c0_i32 = arith.constant 0 : i32
    %c0_i32_0 = arith.constant 0 : i32
    %c0_i32_1 = arith.constant 0 : i32
    return %c0_i32, %c0_i32_0 : i32, i32
  }
  func.func @transform_2(%arg0: i32) -> (i32, i32) {
    %c0_i32 = arith.constant 0 : i32
    %c0_i32_0 = arith.constant 0 : i32
    %c0_i32_1 = arith.constant 0 : i32
    return %c0_i32, %c0_i32_0 : i32, i32
  }
  func.func @transform_3(%arg0: i32) -> (i32, i32) {
    %c0_i32 = arith.constant 0 : i32
    %c0_i32_0 = arith.constant 0 : i32
    %c0_i32_1 = arith.constant 0 : i32
    return %c0_i32, %c0_i32_0 : i32, i32
  }
  func.func @transform_4(%arg0: i32) -> (i32, i32) {
    %c0_i32 = arith.constant 0 : i32
    %c0_i32_0 = arith.constant 0 : i32
    %c0_i32_1 = arith.constant 0 : i32
    return %c0_i32, %c0_i32_0 : i32, i32
  }
  func.func @transform_5(%arg0: i32) -> (i32, i32, i32) {
    %c0_i32 = arith.constant 0 : i32
    %c0_i32_0 = arith.constant 0 : i32
    %c0_i32_1 = arith.constant 0 : i32
    return %arg0, %c0_i32, %c0_i32_0 : i32, i32, i32
  }
  func.func @transform_6(%arg0: i32) -> (i32, i32, i32) {
    %c0_i32 = arith.constant 0 : i32
    %c0_i32_0 = arith.constant 0 : i32
    %c0_i32_1 = arith.constant 0 : i32
    return %arg0, %c0_i32, %c0_i32_0 : i32, i32, i32
  }
  func.func @transform_7(%arg0: i32) -> (i32, i32, i32) {
    %c0_i32 = arith.constant 0 : i32
    %c0_i32_0 = arith.constant 0 : i32
    %c0_i32_1 = arith.constant 0 : i32
    return %arg0, %c0_i32, %c0_i32_0 : i32, i32, i32
  }
  func.func @transform_8(%arg0: i32) -> (i32, i32, i32) {
    %c0_i32 = arith.constant 0 : i32
    %c0_i32_0 = arith.constant 0 : i32
    %c0_i32_1 = arith.constant 0 : i32
    return %arg0, %c0_i32, %c0_i32_0 : i32, i32, i32
  }
  func.func @transform_9(%arg0: i32) -> (i32, i32, i32) {
    %c0_i32 = arith.constant 0 : i32
    %c0_i32_0 = arith.constant 0 : i32
    %c0_i32_1 = arith.constant 0 : i32
    return %arg0, %c0_i32, %c0_i32_0 : i32, i32, i32
  }
  func.func @transform_10(%arg0: i32) -> (i32, i32, i32) {
    %c0_i32 = arith.constant 0 : i32
    %c0_i32_0 = arith.constant 0 : i32
    %c0_i32_1 = arith.constant 0 : i32
    return %arg0, %c0_i32, %c0_i32_0 : i32, i32, i32
  }
  func.func @transform_11(%arg0: i32) -> (i32, i32, i32) {
    %c1_i32 = arith.constant 1 : i32
    %0 = arith.minsi %arg0, %c1_i32 : i32
    %c0_i32 = arith.constant 0 : i32
    %c0_i32_0 = arith.constant 0 : i32
    %c0_i32_1 = arith.constant 0 : i32
    return %0, %c0_i32, %c0_i32_0 : i32, i32, i32
  }
  func.func @transform_12(%arg0: i32) -> (i32, i32, i32) {
    %c1_i32 = arith.constant 1 : i32
    %0 = arith.minsi %arg0, %c1_i32 : i32
    %c0_i32 = arith.constant 0 : i32
    %c0_i32_0 = arith.constant 0 : i32
    %c0_i32_1 = arith.constant 0 : i32
    return %0, %c0_i32, %c0_i32_0 : i32, i32, i32
  }
  func.func @transform_13(%arg0: i32) -> (i32, i32, i32) {
    %c1_i32 = arith.constant 1 : i32
    %0 = arith.minsi %arg0, %c1_i32 : i32
    %c0_i32 = arith.constant 0 : i32
    %c0_i32_0 = arith.constant 0 : i32
    %c0_i32_1 = arith.constant 0 : i32
    return %0, %c0_i32, %c0_i32_0 : i32, i32, i32
  }
  func.func @transform_14(%arg0: i32) -> (i32, i32, i32) {
    %c1_i32 = arith.constant 1 : i32
    %0 = arith.minsi %arg0, %c1_i32 : i32
    %c0_i32 = arith.constant 0 : i32
    %c0_i32_0 = arith.constant 0 : i32
    %c0_i32_1 = arith.constant 0 : i32
    return %0, %c0_i32, %c0_i32_0 : i32, i32, i32
  }
  func.func @transform_15(%arg0: i32) -> (i32, i32) {
    %c0_i32 = arith.constant 0 : i32
    %c0_i32_0 = arith.constant 0 : i32
    %c0_i32_1 = arith.constant 0 : i32
    return %c0_i32, %c0_i32_0 : i32, i32
  }
  func.func @transform_16(%arg0: i32) -> (i32, i32) {
    %c0_i32 = arith.constant 0 : i32
    %c0_i32_0 = arith.constant 0 : i32
    %c0_i32_1 = arith.constant 0 : i32
    return %c0_i32, %c0_i32_0 : i32, i32
  }
  func.func @transform_17(%arg0: i32) -> (i32, i32) {
    %c0_i32 = arith.constant 0 : i32
    %c0_i32_0 = arith.constant 0 : i32
    %c0_i32_1 = arith.constant 0 : i32
    return %c0_i32, %c0_i32_0 : i32, i32
  }
}

</mosaic_0001>

<bundles_post_ra>
// kernel: tpu_custom_call.1
= control target key start
LH: loop header
LB: loop body
LE: loop exit
PB: predicated region body
PF: predicated region fallthrough
CT: control target
= control target key end

     0   :  { %s3410_s0 = inlined_call_operand.vmem [shape: f32[32,128], index: 0, kind: input, shape index: {}]   ;;  %s3411_s1 = inlined_call_operand.vmem [shape: bf16[32,32], index: 1, kind: input, shape index: {}]   ;;  %s3412_s2 = inlined_call_operand.vmem [shape: bf16[32,2], index: 2, kind: input, shape index: {}]   ;;  %s3413_s3 = inlined_call_operand.vmem [shape: bf16[2,32], index: 3, kind: input, shape index: {}]   ;;  %s3414_s4 = inlined_call_operand.vmem [shape: f32[2,1], index: 4, kind: input, shape index: {}]   ;;  %s3415_s5 = inlined_call_operand.vmem [shape: f32[3,1,128], index: 5, kind: input, shape index: {}]   ;;  %s3416_s6 = inlined_call_operand.vmem [shape: f32[3,1,1], index: 6, kind: input, shape index: {}]   ;;  %s3417_s7 = inlined_call_operand.hbm [shape: bf16[3,128,256], index: 7, kind: input, shape index: {}]   ;;  %s3418_s8 = inlined_call_operand.vmem [shape: f32[3,1,256], index: 8, kind: input, shape index: {}]   ;;  %s3419_s9 = inlined_call_operand.hbm [shape: bf16[3,256,128], index: 9, kind: input, shape index: {}]   ;;  %s3420_s10 = inlined_call_operand.vmem [shape: f32[3,1,128], index: 10, kind: input, shape index: {}]   ;;  %s3421_s11 = inlined_call_operand.hbm [shape: bf16[3,128,256], index: 11, kind: input, shape index: {}]   ;;  %s3422_s12 = inlined_call_operand.vmem [shape: f32[3,1,256], index: 12, kind: input, shape index: {}]   ;;  %s3423_s13 = inlined_call_operand.hbm [shape: bf16[3,256,128], index: 13, kind: input, shape index: {}]   ;;  %s3424_s14 = inlined_call_operand.vmem [shape: f32[3,1,128], index: 14, kind: input, shape index: {}]   ;;  %s3425_s15 = inlined_call_operand.vmem [shape: f32[128,4], index: 15, kind: input, shape index: {}]   ;;  %s3426_s16 = inlined_call_operand.vmem [shape: f32[1,4], index: 16, kind: input, shape index: {}]   ;;  %s3427_s17 = inlined_call_operand.hbm [shape: f32[2,4], index: 17, kind: output, shape index: {}]  }
   0x1   :  { %3447 = sst [smem:[#allocation22_spill]] %s3410_s0 }
   0x2   :  { %3448 = sst [smem:[#allocation23_spill]] %s3411_s1 }
   0x3   :  { %3449 = sst [smem:[#allocation24_spill]] %s3412_s2 }
   0x4   :  { %3450 = sst [smem:[#allocation25_spill]] %s3413_s3 }
   0x5   :  { %3451 = sst [smem:[#allocation26_spill]] %s3414_s4 }
   0x6   :  { %3452 = sst [smem:[#allocation27_spill]] %s3416_s6 }
   0x7   :  { %3453 = sst [smem:[#allocation28_spill]] %s3417_s7 }
   0x8   :  { %3454 = sst [smem:[#allocation29_spill]] %s3419_s9 }
   0x9   :  { %3455 = sst [smem:[#allocation30_spill]] %s3421_s11 }
   0xa   :  { %3456 = sst [smem:[#allocation31_spill]] %s3422_s12 }
   0xb   :  { %3457 = sst [smem:[#allocation32_spill]] %s3423_s13 }
   0xc   :  { %3458 = sst [smem:[#allocation33_spill]] %s3424_s14 }
   0xd   :  { %3459 = sst [smem:[#allocation34_spill]] %s3425_s15 }
   0xe   :  { %3460 = sst [smem:[#allocation35_spill]] %s3426_s16 }
   0xf   :  { %3461 = sst [smem:[#allocation36_spill]] %s3427_s17 }
  0x10   :  { %22 = vsyncpa [#allocation5], 0 }
  0x11   :  { %24 = vsyncpa [#allocation5 + $0x1], 0 }
  0x12   :  { %25 = vsyncpa [#allocation8], 0 }
  0x13   :  { %27 = vsyncpa [#allocation8 + $0x1], 0 }
  0x14   :  { %28 = vsyncpa [#allocation11], 0 }
  0x15   :  { %30 = vsyncpa [#allocation11 + $0x1], 0 }
  0x16   :  { %31 = vsyncpa [#allocation6], 0  ;;  %s2814_s24 = smov 0   ;;  %s2816_s25 = smov 0  }
  0x17   :  { %s2818_s26 = smov 0   ;;  %s2820_s27 = smov 0  }
  0x18   :  { %s2822_s28 = smov 0   ;;  %s2824_s29 = smov 0  }
  0x19   :  { %s2826_s0 = smov 0  }
  0x1a LB: > { %3462 = sst [smem:[#allocation18_spill]] %s2697_s28  ;;  %s2848_s30 = sadd.s32 4294967295, %s2705_s0   ;;  %s2705_s0 = sphi %s2826_s0, %s3511_s0   ;;  %s2701_s29 = sphi %s2824_s29, %s3507_s29   ;;  %s2697_s28 = sphi %s2822_s28, %s3506_s28   ;;  %s2693_s27 = sphi %s2820_s27, %s3505_s27   ;;  %s2689_s26 = sphi %s2818_s26, %s3510_s26   ;;  %s2685_s25 = sphi %s2816_s25, %s3509_s25   ;;  %s2681_s24 = sphi %s2814_s24, %s3508_s24  }
  0x1b   : > { %3463 = sst [smem:[#allocation19_spill]] %s2701_s29  ;;  %s2851_s18 = sadd.s32 1, %s2705_s0  }
  0x1c   : > { %s198_s19 = ssub.s32 %s2705_s0, %s2851_s18  ;;  %s201_s1 = sadd.s32 1, %s2701_s29 }
  0x1d   : > { %p199_p0 = scmp.eq.s32.totalorder %s198_s19, 0  ;;  %p208_p1 = scmp.ne.s32.totalorder %s2701_s29, %s2697_s28 }
  0x1e   : > { %p3436_p2 = scmp.eq.s32.totalorder %s2705_s0, 0  ;;  %p214_p3 = scmp.ne.s32.totalorder %s2697_s28, %s2693_s27 }
  0x1f   : > { %s2861_s20 = scalar_select %p199_p0, %s2701_s29, %s201_s1  }
  0x20   : > { %p210_p4 = por %p3436_p2, %p208_p1  ;;  %p3435_p5 = scmp.eq.s32.totalorder %s2848_s30, 0 }
  0x21   : > { %3464 = sst [smem:[#allocation20_spill]] %s2861_s20  ;;  %p3434_p6 = scmp.lt.s32.totalorder %s2705_s0, 3 }
  0x22   : > { %p2869_p7 = por %p3435_p5, %p214_p3  ;;  %s3430_s22 = sand.u32 1, %s2701_s29  }
  0x23   : > { %s2876_s23 = sshll.u32 %s3430_s22, 7  ;;  %s3432_s19 = sshll.u32 %s2705_s0, 11 }
  0x24   : > { %s3465_s21 = scalar_select %p2869_p7, 1, 0 }
  0x25   : > { %p2881_p8 = pnand %p3434_p6, %p210_p4  ;;  %s560_s1 = sand.u32 1, %s2705_s0  }
  0x26   : > { %s3467_s9 = sld [smem:[#allocation29_spill]]  ;;  %s564_s22 = scalar_lea.vmem [#allocation7], %s2876_s23 }
  0x27   : > { %s571_s15 = sshll.u32 %s564_s22, 4  ;;  %s2896_s4 = scalar_lea.sflag [#allocation8], %s560_s1  ;;  %s2894_s15 = int_to_ptr.vmem [resolvable:$true] %s571_s15 }
  0x28   : > { %p2497_p10 = pneg %p2881_p8 }
  0x2c   : > { %s2891_s16 = scalar_lea.hbm %s3467_s9, %s3432_s19  ;;  %s2500_s19 = scalar_lea.hbm %s3467_s9, 6144 }
  0x2d   : > { %s2495_s3 = scalar_lea.hbm %s2891_s16, 2048  ;;  %p2501_p13 = scmp.lt.s32.totalorder %s2891_s16, %s3467_s9 }
  0x2e   : > { %p2496_p9 = scmp.ne.s32.totalorder %s2891_s16, %s2495_s3  ;;  %p2502_p0 = scmp.lt.s32.totalorder %s2500_s19, %s2495_s3 }
  0x30   : > { %p2498_p11 = pnand %p2497_p10, %p2496_p9  ;;  %p2503_p1 = por %p2502_p0, %p2501_p13 }
  0x32   : > { %p2499_p12 = pneg %p2498_p11 }
  0x34   : > { %p2504_p3 = pnand %p2503_p1, %p2499_p12 }
  0x36   : > { %2507 = shalt.err (!%p2504_p3)
}
  0x37   : > { %s2508_s22 = scalar_lea.vmem %s2894_s15, 2048  ;;  %s2707_s1 = smov [#allocation7]  }
  0x38   : > { %p2509_p4 = scmp.ne.s32.totalorder %s2894_s15, %s2508_s22  ;;  %s2513_s17 = sshll.u32 %s2707_s1, 4  ;;  %s2514_s17 = int_to_ptr.vmem [resolvable:$false] %s2513_s17 }
  0x39   : > { %s2515_s20 = scalar_lea.vmem %s2514_s17, 4096  ;;  %p2516_p6 = scmp.lt.s32.totalorder %s2894_s15, %s2514_s17 }
  0x3a   : > { %p2511_p9 = pnand %p2509_p4, %p2497_p10  ;;  %p2517_p5 = scmp.lt.s32.totalorder %s2515_s20, %s2508_s22 }
  0x3c   : > { %p2512_p11 = pneg %p2511_p9  ;;  %p2518_p2 = por %p2517_p5, %p2516_p6 }
  0x3e   : > { %p2519_p13 = pnand %p2518_p2, %p2512_p11 }
  0x40   : > { %2522 = shalt.err (!%p2519_p13)
}
  0x41   : > { %s3437_s2 = smov 64   ;;  %s3438_s3 = smov 4  }
  0x42   : > { %2330 = dma.hbm_to_vmem [thread:$0]  (!%p2881_p8), %s2891_s16, 2048, %s2894_s15, %s2896_s4, %s3437_s2, %s3437_s2, %s3438_s3  }
  0x43   : > { %p2086_p5 = scmp.ge.s32.totalorder %s2705_s0, 1  ;;  %p652_p2 = scmp.lt.s32.totalorder %s2705_s0, 4 }
  0x44   : > { %s3469_s19 = sshll.u32 %s2705_s0, 11  ;;  %s3470_s7 = sld [smem:[#allocation28_spill]] }
  0x45   : > { %p2928_p6 = pnand %p2086_p5, %p652_p2  ;;  %s536_s20 = scalar_lea.vmem [#allocation4], %s2876_s23 }
  0x46   : > { %s543_s9 = sshll.u32 %s536_s20, 4  ;;  %s3471_s15 = sand.u32 1, %s2701_s29   ;;  %s2940_s9 = int_to_ptr.vmem [resolvable:$true] %s543_s9 }
  0x47   : > { %s2944_s16 = scalar_lea.sflag [#allocation5], %s3471_s15 }
  0x4a   : > { %s2937_s17 = scalar_lea.hbm %s3470_s7, %s3469_s19  ;;  %s2528_s19 = scalar_lea.hbm %s3470_s7, 6144 }
  0x4b   : > { %s2523_s2 = scalar_lea.hbm %s2937_s17, 2048  ;;  %p2529_p3 = scmp.lt.s32.totalorder %s2937_s17, %s3470_s7 }
  0x4c   : > { %p2524_p12 = scmp.ne.s32.totalorder %s2937_s17, %s2523_s2  ;;  %p2530_p4 = scmp.lt.s32.totalorder %s2528_s19, %s2523_s2 }
  0x4e   : > { %p2526_p0 = pnand %p2524_p12, %p2497_p10  ;;  %p2531_p9 = por %p2530_p4, %p2529_p3 }
  0x50   : > { %p2527_p1 = pneg %p2526_p0 }
  0x52   : > { %p2532_p11 = pnand %p2531_p9, %p2527_p1 }
  0x54   : > { %2535 = shalt.err (!%p2532_p11)
}
  0x55   : > { %s2536_s23 = scalar_lea.vmem %s2940_s9, 2048  ;;  %s2710_s3 = smov [#allocation4]  }
  0x56   : > { %p2537_p13 = scmp.ne.s32.totalorder %s2940_s9, %s2536_s23  ;;  %s2541_s20 = sshll.u32 %s2710_s3, 4  ;;  %s2542_s20 = int_to_ptr.vmem [resolvable:$false] %s2541_s20 }
  0x57   : > { %s2543_s15 = scalar_lea.vmem %s2542_s20, 4096  ;;  %p2544_p12 = scmp.lt.s32.totalorder %s2940_s9, %s2542_s20 }
  0x58   : > { %p2539_p5 = pnand %p2537_p13, %p2497_p10  ;;  %p2545_p0 = scmp.lt.s32.totalorder %s2543_s15, %s2536_s23 }
  0x5a   : > { %p2540_p2 = pneg %p2539_p5  ;;  %p2546_p7 = por %p2545_p0, %p2544_p12 }
  0x5c   : > { %p2547_p3 = pnand %p2546_p7, %p2540_p2 }
  0x5e   : > { %2550 = shalt.err (!%p2547_p3)
}
  0x5f   : > { %s3440_s12 = smov 128   ;;  %s3443_s2 = smov 8  }
  0x60   : > { %2327 = dma.hbm_to_vmem [thread:$0]  (!%p2881_p8), %s2937_s17, 2048, %s2940_s9, %s2944_s16, %s3440_s12, %s3440_s12, %s3443_s2  }
  0x61   : > { %p302_p7 = scmp.lt.s32.totalorder %s2705_s0, 1  ;;  %p304_p10 = scmp.lt.s32.totalorder %s2851_s18, 1 }
  0x62   : > { %s309_s22 = sadd.s32 1, %s2689_s26  ;;  %p316_p1 = scmp.ne.s32.totalorder %s2689_s26, %s2685_s25 }
  0x63   : > { %s2978_s19 = scalar_select %p302_p7, %s2705_s0, 1 }
  0x64   : > { %s305_s1 = scalar_select %p304_p10, %s2851_s18, 1 }
  0x65   : > { %p3472_p4 = scmp.eq.s32.totalorder %s2705_s0, 0  ;;  %p322_p11 = scmp.ne.s32.totalorder %s2685_s25, %s2681_s24 }
  0x66   : > { %s306_s27 = ssub.s32 %s2978_s19, %s305_s1  ;;  %s3441_s23 = sand.u32 1, %s2689_s26  }
  0x67   : > { %p318_p9 = por %p316_p1, %p3472_p4  ;;  %p307_p13 = scmp.eq.s32.totalorder %s306_s27, 0 }
  0x68   : > { %p3473_p5 = scmp.eq.s32.totalorder %s2848_s30, 0  ;;  %s2995_s17 = sshll.u32 %s3441_s23, 7 }
  0x69   : > { %s3442_s16 = sshll.u32 %s2978_s19, 11  ;;  %s3476_s11 = sld [smem:[#allocation30_spill]] }
  0x6a   : > { %p2989_p2 = por %p322_p11, %p3473_p5  ;;  %s591_s1 = scalar_lea.vmem [#allocation9], %s2995_s17 }
  0x6b   : > { %s2999_s3 = scalar_select %p307_p13, %s2689_s26, %s309_s22  }
  0x6c   : > { %s3474_s9 = scalar_select %p2989_p2, 1, 0 }
  0x6d   : > { %3475 = sst [smem:[#allocation21_spill]] %s2999_s3  ;;  %s600_s27 = sshll.u32 %s591_s1, 4  ;;  %s3015_s27 = int_to_ptr.vmem [resolvable:$true] %s600_s27 }
  0x6e   : > { %p3477_p8 = scmp.lt.s32.totalorder %s2705_s0, 3 }
  0x6f   : > { %s3006_s24 = scalar_lea.hbm %s3476_s11, %s3442_s16  ;;  %s2556_s0 = scalar_lea.hbm %s3476_s11, 6144 }
  0x70   : > { %p3011_p12 = pnand %p3477_p8, %p318_p9  ;;  %s2551_s22 = scalar_lea.hbm %s3006_s24, 2048 }
  0x71   : > { %p2552_p0 = scmp.ne.s32.totalorder %s3006_s24, %s2551_s22  ;;  %p2557_p1 = scmp.lt.s32.totalorder %s3006_s24, %s3476_s11 }
  0x72   : > { %p2553_p3 = pneg %p3011_p12  ;;  %p2558_p4 = scmp.lt.s32.totalorder %s2556_s0, %s2551_s22 }
  0x74   : > { %p2554_p7 = pnand %p2553_p3, %p2552_p0  ;;  %p2559_p9 = por %p2558_p4, %p2557_p1 }
  0x76   : > { %p2555_p10 = pneg %p2554_p7 }
  0x78   : > { %p2560_p11 = pnand %p2559_p9, %p2555_p10 }
  0x7a   : > { %2563 = shalt.err (!%p2560_p11)
}
  0x7b   : > { %s2564_s16 = scalar_lea.vmem %s3015_s27, 2048  ;;  %s2713_s20 = smov [#allocation9]  }
  0x7c   : > { %p2565_p13 = scmp.ne.s32.totalorder %s3015_s27, %s2564_s16  ;;  %s2569_s15 = sshll.u32 %s2713_s20, 4  ;;  %s2570_s15 = int_to_ptr.vmem [resolvable:$false] %s2569_s15 }
  0x7d   : > { %s2571_s2 = scalar_lea.vmem %s2570_s15, 4096  ;;  %p2572_p0 = scmp.lt.s32.totalorder %s3015_s27, %s2570_s15 }
  0x7e   : > { %p2567_p5 = pnand %p2565_p13, %p2553_p3  ;;  %p2573_p7 = scmp.lt.s32.totalorder %s2571_s2, %s2564_s16 }
  0x80   : > { %p2568_p8 = pneg %p2567_p5  ;;  %p2574_p2 = por %p2573_p7, %p2572_p0 }
  0x82   : > { %p2575_p1 = pnand %p2574_p2, %p2568_p8 }
  0x84   : > { %2578 = shalt.err (!%p2575_p1)
}
  0x85   : > { %s3479_s23 = smov 8   ;;  %s3480_s22 = smov 128  }
  0x86   : > { %2333 = dma.hbm_to_vmem [thread:$0]  (!%p3011_p12), %s3006_s24, 2048, %s3015_s27, %s2896_s4, %s3480_s22, %s3480_s22, %s3479_s23  }
  0x87   : > { %s3481_s0 = sshll.u32 %s2978_s19, 11  ;;  %s3482_s13 = sld [smem:[#allocation32_spill]] }
  0x88   : > { %s625_s16 = scalar_lea.vmem [#allocation10], %s2995_s17  ;;  %s3483_s7 = sand.u32 1, %s2689_s26  }
  0x89   : > { %s634_s15 = sshll.u32 %s625_s16, 4  ;;  %s622_s11 = scalar_lea.sflag [#allocation11], %s3483_s7  ;;  %s3053_s15 = int_to_ptr.vmem [resolvable:$true] %s634_s15 }
  0x8d   : > { %s3050_s2 = scalar_lea.hbm %s3482_s13, %s3481_s0  ;;  %s2584_s24 = scalar_lea.hbm %s3482_s13, 6144 }
  0x8e   : > { %s2579_s29 = scalar_lea.hbm %s3050_s2, 2048  ;;  %p2585_p9 = scmp.lt.s32.totalorder %s3050_s2, %s3482_s13 }
  0x8f   : > { %p2580_p2 = scmp.ne.s32.totalorder %s3050_s2, %s2579_s29  ;;  %p2586_p11 = scmp.lt.s32.totalorder %s2584_s24, %s2579_s29 }
  0x91   : > { %p2582_p10 = pnand %p2580_p2, %p2553_p3  ;;  %p2587_p13 = por %p2586_p11, %p2585_p9 }
  0x93   : > { %p2583_p4 = pneg %p2582_p10 }
  0x95   : > { %p2588_p5 = pnand %p2587_p13, %p2583_p4 }
  0x97   : > { %2591 = shalt.err (!%p2588_p5)
}
  0x98   : > { %s2592_s7 = scalar_lea.vmem %s3053_s15, 2048  ;;  %s2714_s17 = smov [#allocation10]  }
  0x99   : > { %p2593_p8 = scmp.ne.s32.totalorder %s3053_s15, %s2592_s7  ;;  %s2597_s22 = sshll.u32 %s2714_s17, 4  ;;  %s2598_s22 = int_to_ptr.vmem [resolvable:$false] %s2597_s22 }
  0x9a   : > { %s2599_s0 = scalar_lea.vmem %s2598_s22, 4096  ;;  %p2600_p1 = scmp.lt.s32.totalorder %s3053_s15, %s2598_s22 }
  0x9b   : > { %p2595_p0 = pnand %p2593_p8, %p2553_p3  ;;  %p2601_p2 = scmp.lt.s32.totalorder %s2599_s0, %s2592_s7 }
  0x9d   : > { %p2596_p7 = pneg %p2595_p0  ;;  %p2602_p10 = por %p2601_p2, %p2600_p1 }
  0x9f   : > { %p2603_p9 = pnand %p2602_p10, %p2596_p7 }
  0xa1   : > { %2606 = shalt.err (!%p2603_p9)
}
  0xa2   : > { %s3484_s29 = smov 4   ;;  %s3485_s1 = smov 64  }
  0xa3   : > { %2336 = dma.hbm_to_vmem [thread:$0]  (!%p3011_p12), %s3050_s2, 2048, %s3053_s15, %s622_s11, %s3485_s1, %s3485_s1, %s3484_s29  }
  0xa4   : > { %656 = sbr.rel (%p2928_p6) target bundleno = 2084 (0x824), region = 88  ;;  %s658_s20 = sand.u32 (!%p2928_p6), 1, %s2697_s28  }
  0xa5   : > { %s2087_s16 = sshll.u32 (!%p2928_p6), %s658_s20, 7  ;;  %s659_s4 = scalar_lea.sflag (!%p2928_p6), [#allocation5], %s658_s20 }
  0xa6   : > { %s3085_s19 = scalar_lea.vmem (!%p2928_p6), [#allocation4], %s2087_s16  ;;  %p3486_p3 = scmp.ne.s32.totalorder (!%p2928_p6), %s3465_s21, 0 }
  0xa9   : > { %2660 = dma.done.wait (%p3486_p3), %s659_s4, 2048  }
  0xaa   : > { %2662 = vsyncadd (%p3486_p3), %s659_s4, 4294965248  ;;  %s667_s12 = sand.u32 1, %s2848_s30   ;;  %s3092_s11 = scalar_lea.vmem [#allocation7], %s2087_s16 }
  0xab   : > { %s668_s24 = scalar_lea.sflag [#allocation8], %s667_s12 }
  0xac   : > { %2664 = dma.done.wait (%p3486_p3), %s668_s24, 2048  }
  0xad   : > { %2666 = vsyncadd (%p3486_p3), %s668_s24, 4294965248  ;;  %s678_s14 = sand.u32 1, %s2685_s25   ;;  %p3487_p6 = scmp.ne.s32.totalorder %s3474_s9, 0 }
  0xae   : > { %s2089_s2 = sshll.u32 %s678_s14, 7 }
  0xaf   : > { %s3099_s15 = scalar_lea.vmem [#allocation9], %s2089_s2 }
  0xb0   : > { %2668 = dma.done.wait (%p3487_p6), %s668_s24, 2048  }
  0xb1   : > { %2670 = vsyncadd (%p3487_p6), %s668_s24, 4294965248  ;;  %s686_s27 = scalar_lea.sflag [#allocation11], %s678_s14  ;;  %s3105_s23 = scalar_lea.vmem [#allocation10], %s2089_s2 }
  0xb2   : > { %2672 = dma.done.wait (%p3487_p6), %s686_s27, 2048  }
  0xb3   : > { %2674 = vsyncadd (%p3487_p6), %s686_s27, 4294965248  ;;  %p774_p12 = scmp.lt.s32.totalorder %s2848_s30, 2  ;;  %p789_p4 = scmp.lt.s32.totalorder %s2848_s30, 1 }
  0xb4   : > { %s3488_s6 = sld [smem:[#allocation27_spill]]  ;;  %p2099_p11 = scmp.ne.s32.totalorder %s2848_s30, 0 }
  0xb5   : > { %s3114_s21 = scalar_select %p774_p12, %s2848_s30, 2 }
  0xb6   : > { %s3117_s7 = scalar_select %p789_p4, %s2848_s30, 1 }
  0xb7   : > { %s2091_s20 = sshll.u32 %s3114_s21, 1  ;;  %s3489_s22 = sld [smem:[#allocation31_spill]] }
  0xb8   : > { %s3135_s2 = scalar_lea.vmem %s3418_s8, %s2091_s20  ;;  %s2095_s27 = sshll.u32 %s3117_s7, 1 }
  0xb9   : > { %s3490_s0 = sld [smem:[#allocation33_spill]] }
  0xba   : > { %s779_s1 = scalar_lea.vmem %s3488_s6, %s3114_s21  ;;  %s3491_s12 = sld [smem:[#allocation22_spill]] (!%p2099_p11) }
  0xbb   : > { %811 = sbr.rel (%p2099_p11) target bundleno = 196 (0xc4), region = 108 }
  0xbd   : > { %s3141_s28 = scalar_lea.vmem %s3489_s22, %s2095_s27 }
  0xbf   : > { %s803_s29 = scalar_lea.vmem %s3490_s0, %s3117_s7 }
  0xc0   : > { %v812_v0 = vld [vmem:[%s3491_s12] sm:$0xff]  ;;  %v813_v1 = vld [vmem:[%s3491_s12 + $0x8] sm:$0xff]  ;;  %v814_v2 = vld [vmem:[%s3491_s12 + $0x10] sm:$0xff]  ;;  %v2715_v4 = vmov 0.0  }
  0xc1   : > { %816 = vst [vmem:[#allocation2 + $0x10] sm:$0xff] %v812_v0  ;;  %817 = vst [vmem:[#allocation2] sm:$0xff] %v813_v1  ;;  %v815_v3 = vld [vmem:[%s3491_s12 + $0x18] sm:$0xff] }
  0xc2   : > { %818 = vst [vmem:[#allocation2 + $0x18] sm:$0xff] %v814_v2  ;;  %820 = vst [vmem:[#allocation3] sm:$0x3] %v2715_v4 }
  0xc3   : > { %819 = vst [vmem:[#allocation2 + $0x8] sm:$0xff] %v815_v3 }
  0xc4 PF: > { %vm848_vm0 = vcmask 1040384   ;;  %s3492_s17 = sld [smem:[#allocation24_spill]]  ;;  %vm841_vm1 = vcmask 15360   ;;  %v2109_v9 = vld [vmem:[%s779_s1] ss:$0 sm:$0xff]  ;;  %v2716_v11 = vmov 0   ;;  %s3494_s20 = scalar_lea.vmem %s3415_s5, %s3114_s21 }
  0xc5   : > { %2409 = vset.pattern.permute.xlu0 %v2716_v11  ;;  %s3493_s4 = sld [smem:[#allocation23_spill]]  ;;  %vm936_vm2 = vcmask 261120   ;;  %v2414_v13 = vld [vmem:[%s3085_s19 + $0x70] ss:$8 sps:$4 sm:$0xff]   ;;  %v2416_v14 = vld [vmem:[%s3085_s19 + $0x74] ss:$8 sps:$4 sm:$0xff]  }
  0xc6   : > { %999 = vperm.xlu0 %2409, %v2109_v9   ;;  %v2419_v15 = vld [vmem:[%s3085_s19 + $0x64] ss:$8 sps:$4 sm:$0xff]   ;;  %v2417_v16 = vld [vmem:[%s3085_s19 + $0x60] ss:$8 sps:$4 sm:$0xff]   ;;  %v2422_v17 = vld [vmem:[%s3085_s19 + $0x54] ss:$8 sps:$4 sm:$0xff]  }
  0xc7   : > { %v2420_v18 = vld [vmem:[%s3085_s19 + $0x50] ss:$8 sps:$4 sm:$0xff]   ;;  %v2425_v19 = vld [vmem:[%s3085_s19 + $0x44] ss:$8 sps:$4 sm:$0xff]   ;;  %v2423_v20 = vld [vmem:[%s3085_s19 + $0x40] ss:$8 sps:$4 sm:$0xff]  }
  0xc8   : > { %v2428_v21 = vld [vmem:[%s3085_s19 + $0x34] ss:$8 sps:$4 sm:$0xff]   ;;  %v2426_v22 = vld [vmem:[%s3085_s19 + $0x30] ss:$8 sps:$4 sm:$0xff]   ;;  %v2431_v23 = vld [vmem:[%s3085_s19 + $0x24] ss:$8 sps:$4 sm:$0xff]  }
  0xc9   : > { %v3160_v5 = vld [vmem:[#allocation3] sm:$0x3]  ;;  %v2429_v24 = vld [vmem:[%s3085_s19 + $0x20] ss:$8 sps:$4 sm:$0xff]   ;;  %v823_v25 = vld [vmem:[#allocation2 + $0x18] sm:$0xff]  ;;  %p2143_p13 = scmp.eq.s32.totalorder %s2848_s30, 2 }
  0xca   : > { %v2410_v6 = vld [vmem:[%s3492_s17] sm:$0xff]   ;;  %v830_v7 = vpack.c.bf16 %v3160_v5, %v3160_v5  ;;  %v2411_v8 = vld [vmem:[%s3492_s17 + $0x8] sm:$0xff]   ;;  %v821_v27 = vld [vmem:[#allocation2 + $0x10] sm:$0xff]  ;;  %s3496_s9 = sld [smem:[#allocation25_spill]] (!%p2143_p13) }
  0xcb   : > { %2263 = vmatprep.mubr.msk.bf16.mxu0 %vm841_vm1, %v2410_v6  ;;  %v2412_v12 = vld [vmem:[%s3493_s4] sm:$0xff]   ;;  %v824_v31 = vld [vmem:[#allocation2 + $0x8] sm:$0xff]  ;;  %v2432_v50 = vld [vmem:[%s3085_s19 + $0x10] ss:$8 sps:$4 sm:$0xff]  }
  0xcc   : > { %2311 = vmatprep.subr.msk.bf16.mxu0 %vm848_vm0, %v830_v7  ;;  %v850_v10 = vsel %vm848_vm0, %v830_v7, 0  ;;  %2271 = vmatprep.mubr.msk.bf16.mxu1 %vm936_vm2, %v2412_v12  ;;  %v2104_v29 = vld [vmem:[%s3494_s20] ss:$0 sm:$0xff]  ;;  %v2413_v48 = vld [vmem:[%s3493_s4 + $0x8] sm:$0xff]   ;;  %v2440_v55 = vld [vmem:[%s3092_s11 + $0x70] sm:$0xff]  }
  0xcd   : > { %2262 = vmatpush3.bf16.msra.mxu0 %v850_v10  ;;  %v822_v34 = vld [vmem:[#allocation2] sm:$0xff]  ;;  %v2441_v56 = vld [vmem:[%s3092_s11 + $0x30] sm:$0xff]   ;;  %v2442_v57 = vld [vmem:[%s3092_s11 + $0x68] sm:$0xff]  }
  0xce   : > { %1120 = vmatprep.subr.bf16.mxu0 %v2416_v14  ;;  %v2434_v49 = vld [vmem:[%s3085_s19 + $0x14] ss:$8 sps:$4 sm:$0xff]   ;;  %v2437_v51 = vld [vmem:[%s3085_s19 + $0x4] ss:$8 sps:$4 sm:$0xff]   ;;  %v2435_v52 = vld [vmem:[%s3085_s19] ss:$8 sps:$4 sm:$0xff]  }
  0xcf   : > { %v2438_v53 = vld [vmem:[%s3092_s11 + $0x78] sm:$0xff]   ;;  %v2443_v58 = vld [vmem:[%s3092_s11 + $0x28] sm:$0xff]   ;;  %v2444_v59 = vld [vmem:[%s3092_s11 + $0x60] sm:$0xff]  }
  0xd0   : > { %2264 = vmatmul.mubr.msk.bf16.vlgmr.msra.gmra.mxu0 %vm841_vm1, %v2411_v8  ;;  %v2439_v54 = vld [vmem:[%s3092_s11 + $0x38] sm:$0xff]   ;;  %v2445_v60 = vld [vmem:[%s3092_s11 + $0x20] sm:$0xff]  }
  0xd1   : > { %1152 = vmatprep.mubr.bf16.mxu0 %v2716_v11  ;;  %1121 = vmatpush1.bf16.msra.mxu0 %v2414_v13  ;;  %v2446_v61 = vld [vmem:[%s3092_s11 + $0x58] sm:$0xff]  }
  0xd2   : > { %1122 = vmatprep.subr.bf16.mxu0 %v2419_v15  ;;  %v2447_v62 = vld [vmem:[%s3092_s11 + $0x18] sm:$0xff]  }
  0xd5   : > { %1123 = vmatpush1.bf16.msra.mxu0 %v2417_v16  ;;  %v2448_v16 = vld [vmem:[%s3092_s11 + $0x50] sm:$0xff]  }
  0xd6   : > { %1124 = vmatprep.subr.bf16.mxu0 %v2422_v17  ;;  %v2449_v17 = vld [vmem:[%s3092_s11 + $0x10] sm:$0xff]  }
  0xd9   : > { %1125 = vmatpush1.bf16.msra.mxu0 %v2420_v18  ;;  %v2450_v18 = vld [vmem:[%s3092_s11 + $0x48] sm:$0xff]  }
  0xda   : > { %1126 = vmatprep.subr.bf16.mxu0 %v2425_v19  ;;  %v2451_v19 = vld [vmem:[%s3092_s11 + $0x8] sm:$0xff]  }
  0xdd   : > { %1127 = vmatpush1.bf16.msra.mxu0 %v2423_v20  ;;  %v2452_v20 = vld [vmem:[%s3092_s11 + $0x40] sm:$0xff]  }
  0xde   : > { %1128 = vmatprep.subr.bf16.mxu0 %v2428_v21  ;;  %v2453_v21 = vld [vmem:[%s3092_s11] sm:$0xff]  }
  0xe1   : > { %1129 = vmatpush1.bf16.msra.mxu0 %v2426_v22  ;;  %v1030_v22 = vlaneseq }
  0xe2   : > { %1130 = vmatprep.subr.bf16.mxu0 %v2431_v23 }
  0xe3   : > { %v3234_v23 = vshrl.u32 %v1030_v22, 7 }
  0xe5   : > { %1131 = vmatpush1.bf16.msra.mxu0 %v2429_v24  ;;  %v1036_v24 = vsub.s32 1, %v3234_v23 }
  0xe6   : > { %1132 = vmatprep.subr.bf16.mxu0 %v2434_v49 }
  0xe9   : > { %1133 = vmatpush1.bf16.msra.mxu0 %v2432_v50 }
  0xea   : > { %1134 = vmatprep.subr.bf16.mxu0 %v2437_v51 }
  0xed   : > { %1135 = vmatpush1.bf16.msra.mxu0 %v2435_v52 }
 0x141   : > { %v1000_v63 = vpop.permute.xlu0 %999 }
 0x190   : > { %v2265_v26 = vpop.f32.mrf.mxu0 }
 0x191   : > { %v3188_v28 = vadd.f32 %v2265_v26, %v823_v25  ;;  %v1028_v25 = vld [vmem:[%s3135_s2] sm:$0x3]  ;;  %s3495_s2 = scalar_lea.vmem %s3420_s10, %s3114_s21 }
 0x192   : > { %v886_v30 = vpop.f32.mrf.mxu0 }
 0x193   : > { %v3195_v32 = vadd.f32 %v886_v30, %v821_v27  ;;  %v918_v35 = vadd.f32 %v2104_v29, %v3188_v28  ;;  %v1004_v2 = vmul.f32 %v1000_v63, %v3188_v28  ;;  %v1037_v27 = vrot.slane %v1028_v25, %v1036_v24 }
 0x194   : > { %v2266_v33 = vpop.f32.mrf.mxu0 }
 0x195   : > { %v3198_v36 = vadd.f32 %v2266_v33, %v824_v31  ;;  %v916_v38 = vadd.f32 %v2104_v29, %v3195_v32  ;;  %v922_v41 = vmax.f32 %v918_v35, 0.0  ;;  %v1002_v7 = vmul.f32 %v1000_v63, %v3195_v32 }
 0x196   : > { %v889_v37 = vpop.f32.mrf.mxu0 }
 0x197   : > { %v919_v39 = vadd.f32 %v2104_v29, %v3198_v36  ;;  %v3202_v40 = vadd.f32 %v889_v37, %v822_v34  ;;  %v920_v44 = vmax.f32 %v916_v38, 0.0  ;;  %v1005_v3 = vmul.f32 %v1000_v63, %v3198_v36 }
 0x199   : > { %v923_v42 = vmax.f32 %v919_v39, 0.0  ;;  %v917_v43 = vadd.f32 %v2104_v29, %v3202_v40  ;;  %v1003_v9 = vmul.f32 %v1000_v63, %v3202_v40 }
 0x19b   : > { %v921_v45 = vmax.f32 %v917_v43, 0.0  ;;  %v925_v46 = vpack.c.bf16 %v923_v42, %v922_v41 }
 0x19d   : > { %2267 = vmatprep.subr.bf16.mxu1 %v925_v46  ;;  %v924_v47 = vpack.c.bf16 %v921_v45, %v920_v44 }
 0x19e   : > { %2268 = vmatpush3.bf16.msra.mxu1 %v925_v46 }
 0x19f   : > { %2269 = vmatprep.subr.bf16.mxu1 %v924_v47 }
 0x1a2   : > { %2270 = vmatpush3.bf16.msra.mxu1 %v924_v47 }
 0x1a3   : > { %2196 = vmatprep.subr.bf16.mxu1 %v2438_v53 }
 0x1a5   : > { %2272 = vmatmul.mubr.msk.bf16.vlgmr.msra.gmra.mxu1 %vm936_vm2, %v2413_v48 }
 0x1a6   : > { %2197 = vmatpush3.bf16.msra.mxu1 %v2439_v54 }
 0x1a7   : > { %2198 = vmatprep.subr.bf16.mxu1 %v2440_v55 }
 0x1aa   : > { %2199 = vmatpush3.bf16.msra.mxu1 %v2441_v56 }
 0x1ab   : > { %2200 = vmatprep.subr.bf16.mxu1 %v2442_v57 }
 0x1ae   : > { %2201 = vmatpush3.bf16.msra.mxu1 %v2443_v58 }
 0x1af   : > { %2202 = vmatprep.subr.bf16.mxu1 %v2444_v59 }
 0x1b2   : > { %2203 = vmatpush3.bf16.msra.mxu1 %v2445_v60 }
 0x1b3   : > { %2204 = vmatprep.subr.bf16.mxu1 %v2446_v61  ;;  %v2126_v61 = vld [vmem:[%s3495_s2] ss:$0 sm:$0xff] }
 0x1b6   : > { %2205 = vmatpush3.bf16.msra.mxu1 %v2447_v62 }
 0x1b7   : > { %2206 = vmatprep.subr.bf16.mxu1 %v2448_v16 }
 0x1ba   : > { %2207 = vmatpush3.bf16.msra.mxu1 %v2449_v17 }
 0x1bb   : > { %2208 = vmatprep.subr.bf16.mxu1 %v2450_v18 }
 0x1be   : > { %2209 = vmatpush3.bf16.msra.mxu1 %v2451_v19 }
 0x1bf   : > { %2210 = vmatprep.subr.bf16.mxu1 %v2452_v20 }
 0x1c2   : > { %2211 = vmatpush3.bf16.msra.mxu1 %v2453_v21 }
 0x265   : > { %v2273_v0 = vpop.f32.mrf.mxu1 }
 0x266   : > { %v1008_v6 = vadd.f32 %v2273_v0, %v1004_v2 }
 0x267   : > { %v977_v1 = vpop.f32.mrf.mxu1 }
 0x268   : > { %v1006_v12 = vadd.f32 %v1002_v7, %v977_v1 }
 0x269   : > { %v2274_v4 = vpop.f32.mrf.mxu1 }
 0x26a   : > { %v1009_v8 = vadd.f32 %v2274_v4, %v1005_v3 }
 0x26b   : > { %v980_v10 = vpop.f32.mrf.mxu1 }
 0x26c   : > { %v1027_v13 = vpack.c.bf16 %v1009_v8, %v1008_v6  ;;  %v1007_v14 = vadd.f32 %v1003_v9, %v980_v10 }
 0x26e   : > { %v1026_v15 = vpack.c.bf16 %v1007_v14, %v1006_v12 }
 0x270   : > { %1153 = vmatmul.mubr.bf16.vlgmr.msra.gmra.mxu0 %v1026_v15 }
 0x271   : > { %1162 = vmatprep.mubr.bf16.mxu0 %v2716_v11  ;;  %v1032_v11 = vsub.s32 0, %v3234_v23 }
 0x273   : > { %v1033_v29 = vrot.slane %v1028_v25, %v1032_v11 }
 0x278   : > { %1163 = vmatmul.mubr.bf16.gmra.mxu0 %v1027_v13 }
 0x330   : > { %v1154_v26 = vpop.f32.mrf.mxu0 }
 0x331   : > { %v1155_v35 = vadd.f32 %v1154_v26, %v1033_v29 }
 0x332   : > { %v1156_v30 = vpop.f32.mrf.mxu0 }
 0x333   : > { %v1157_v33 = vadd.f32 %v1156_v30, %v1037_v27  ;;  %v1173_v44 = vmax.f32 %v1155_v35, 0.0 }
 0x334   : > { %v1158_v31 = vpop.f32.mrf.mxu0 }
 0x335   : > { %v1159_v34 = vadd.f32 %v1158_v31, %v1033_v29  ;;  %v1174_v42 = vmax.f32 %v1157_v33, 0.0 }
 0x336   : > { %v1160_v37 = vpop.f32.mrf.mxu0 }
 0x337   : > { %v1161_v38 = vadd.f32 %v1160_v37, %v1037_v27  ;;  %v1175_v39 = vmax.f32 %v1159_v34, 0.0 }
 0x338   : > { %v1164_v41 = vpop.f32.mrf.mxu0 }
 0x339   : > { %v1176_v43 = vmax.f32 %v1161_v38, 0.0  ;;  %v1213_v47 = vpack.c.bf16 %v1175_v39, %v1173_v44  ;;  %v1165_v51 = vadd.f32 %v1164_v41, %v1033_v29 }
 0x33a   : > { %v1166_v45 = vpop.f32.mrf.mxu0 }
 0x33b   : > { %v1214_v46 = vpack.c.bf16 %v1176_v43, %v1174_v42  ;;  %v1167_v49 = vadd.f32 %v1166_v45, %v1037_v27  ;;  %v1177_v57 = vmax.f32 %v1165_v51, 0.0 }
 0x33c   : > { %v1168_v48 = vpop.f32.mrf.mxu0 }
 0x33d   : > { %v1169_v50 = vadd.f32 %v1168_v48, %v1033_v29  ;;  %1352 = vmatprep.mubr.bf16.mxu1 %v1214_v46  ;;  %v1178_v55 = vmax.f32 %v1167_v49, 0.0 }
 0x33e   : > { %v1170_v52 = vpop.f32.mrf.mxu0  ;;  %1353 = vmatmul.mubr.bf16.vlgmr.msra.gmra.mxu1 %v1213_v47 }
 0x33f   : > { %v1171_v53 = vadd.f32 %v1170_v52, %v1037_v27  ;;  %v1179_v54 = vmax.f32 %v1169_v50, 0.0 }
 0x341   : > { %v1180_v56 = vmax.f32 %v1171_v53, 0.0  ;;  %v1215_v59 = vpack.c.bf16 %v1179_v54, %v1177_v57 }
 0x343   : > { %v1216_v58 = vpack.c.bf16 %v1180_v56, %v1178_v55 }
 0x345   : > { %1360 = vmatprep.mubr.bf16.mxu1 %v1216_v58 }
 0x346   : > { %1361 = vmatmul.mubr.bf16.gmra.mxu1 %v1215_v59 }
 0x3fe   : > { %v2212_v60 = vpop.f32.mrf.mxu1 }
 0x400   : > { %v2213_v62 = vpop.f32.mrf.mxu1 }
 0x401   : > { %v2214_v63 = vadd.f32 %v2213_v62, %v2212_v60 }
 0x402   : > { %v2215_v0 = vpop.f32.mrf.mxu1 }
 0x403   : > { %v3248_v1 = vadd.f32 %v2214_v63, %v2126_v61 }
 0x404   : > { %v2216_v2 = vpop.f32.mrf.mxu1 }
 0x405   : > { %v2217_v3 = vadd.f32 %v2216_v2, %v2215_v0 }
 0x406   : > { %v2218_v4 = vpop.f32.mrf.mxu1 }
 0x407   : > { %v3250_v6 = vadd.f32 %v2217_v3, %v2126_v61 }
 0x408   : > { %v2219_v7 = vpop.f32.mrf.mxu1 }
 0x409   : > { %v2220_v8 = vadd.f32 %v2219_v7, %v2218_v4 }
 0x40a   : > { %v2221_v9 = vpop.f32.mrf.mxu1 }
 0x40b   : > { %v3252_v10 = vadd.f32 %v2220_v8, %v2126_v61  ;;  %1372 = sbr.rel (%p2143_p13) target bundleno = 1651 (0x673), region = 112 }
 0x40c   : > { %v2222_v12 = vpop.f32.mrf.mxu1 }
 0x40d   : > { %v2223_v13 = vadd.f32 %v2222_v12, %v2221_v9 }
 0x40f   : > { %v3254_v14 = vadd.f32 %v2223_v13, %v2126_v61 }
 0x410   : > { %v1373_v15 = vmax.f32 %v3248_v1, 0.0  ;;  %v1374_v16 = vmax.f32 %v3250_v6, 0.0  ;;  %v1375_v17 = vmax.f32 %v3252_v10, 0.0  ;;  %v1383_v19 = vpack.c.bf16 %v3198_v36, %v3188_v28  ;;  %v2454_v20 = vld [vmem:[%s3099_s15 + $0x74] ss:$8 sps:$4 sm:$0xff]   ;;  %v2482_v46 = vld [vmem:[%s3105_s23 + $0x68] sm:$0xff]  }
 0x411   : > { %v1376_v18 = vmax.f32 %v3254_v14, 0.0  ;;  %v2717_v21 = vmov 0.0   ;;  %vm2718_vm3 = vmmov 0   ;;  %v2456_v22 = vld [vmem:[%s3099_s15 + $0x70] ss:$8 sps:$4 sm:$0xff]   ;;  %v1382_v25 = vpack.c.bf16 %v3202_v40, %v3195_v32  ;;  %1536 = vmatprep.subr.bf16.mxu1 %v2454_v20  ;;  %v2483_v47 = vld [vmem:[%s3105_s23 + $0x28] sm:$0xff]  }
 0x412   : > { %1377 = vst [vmem:[#allocation2 + $0x10] sm:$0xff] %v1373_v15  ;;  %1378 = vst [vmem:[#allocation2] sm:$0xff] %v1374_v16  ;;  %2275 = vmatprep.subr.bf16.mxu0 %v2717_v21  ;;  %2279 = vmatprep.mubr.msk.bf16.mxu0 %vm2718_vm3, %v2717_v21  ;;  %v2457_v28 = vld [vmem:[%s3099_s15 + $0x64] ss:$8 sps:$4 sm:$0xff]   ;;  %v2459_v36 = vld [vmem:[%s3099_s15 + $0x60] ss:$8 sps:$4 sm:$0xff]  }
 0x413   : > { %1379 = vst [vmem:[#allocation2 + $0x18] sm:$0xff] %v1375_v17  ;;  %1380 = vst [vmem:[#allocation2 + $0x8] sm:$0xff] %v1376_v18  ;;  %2276 = vmatpush3.bf16.msra.mxu0 %v1383_v19  ;;  %1537 = vmatpush1.bf16.msra.mxu1 %v2456_v22  ;;  %v2460_v26 = vld [vmem:[%s3099_s15 + $0x54] ss:$8 sps:$4 sm:$0xff]   ;;  %v2462_v29 = vld [vmem:[%s3099_s15 + $0x50] ss:$8 sps:$4 sm:$0xff]  }
 0x414   : > { %2277 = vmatprep.subr.bf16.mxu0 %v2717_v21  ;;  %1538 = vmatprep.subr.bf16.mxu1 %v2457_v28  ;;  %v1381_v27 = vld [vmem:[%s3496_s9] sm:$0x1]  ;;  %v2463_v32 = vld [vmem:[%s3099_s15 + $0x44] ss:$8 sps:$4 sm:$0xff]   ;;  %v2465_v40 = vld [vmem:[%s3099_s15 + $0x40] ss:$8 sps:$4 sm:$0xff]  }
 0x415   : > { %v2466_v30 = vld [vmem:[%s3099_s15 + $0x34] ss:$8 sps:$4 sm:$0xff]   ;;  %v2468_v31 = vld [vmem:[%s3099_s15 + $0x30] ss:$8 sps:$4 sm:$0xff]   ;;  %v2469_v33 = vld [vmem:[%s3099_s15 + $0x24] ss:$8 sps:$4 sm:$0xff]  }
 0x416   : > { %v2471_v34 = vld [vmem:[%s3099_s15 + $0x20] ss:$8 sps:$4 sm:$0xff]   ;;  %v2472_v35 = vld [vmem:[%s3099_s15 + $0x14] ss:$8 sps:$4 sm:$0xff]   ;;  %v2474_v37 = vld [vmem:[%s3099_s15 + $0x10] ss:$8 sps:$4 sm:$0xff]  }
 0x417   : > { %2278 = vmatpush3.bf16.msra.mxu0 %v1382_v25  ;;  %1539 = vmatpush1.bf16.msra.mxu1 %v2459_v36  ;;  %v2475_v38 = vld [vmem:[%s3099_s15 + $0x4] ss:$8 sps:$4 sm:$0xff]   ;;  %v2477_v39 = vld [vmem:[%s3099_s15] ss:$8 sps:$4 sm:$0xff]   ;;  %v2719_v41 = vmov 0   ;;  %v2478_v42 = vld [vmem:[%s3105_s23 + $0x78] sm:$0xff]  }
 0x418   : > { %1540 = vmatprep.subr.bf16.mxu1 %v2460_v26  ;;  %1568 = vmatprep.mubr.bf16.mxu1 %v2719_v41  ;;  %v2479_v43 = vld [vmem:[%s3105_s23 + $0x38] sm:$0xff]   ;;  %v2480_v44 = vld [vmem:[%s3105_s23 + $0x70] sm:$0xff]   ;;  %v2484_v48 = vld [vmem:[%s3105_s23 + $0x60] sm:$0xff]  }
 0x419   : > { %2227 = vmatprep.subr.bf16.mxu0 %v2478_v42  ;;  %v2481_v45 = vld [vmem:[%s3105_s23 + $0x30] sm:$0xff]   ;;  %v2485_v49 = vld [vmem:[%s3105_s23 + $0x20] sm:$0xff]   ;;  %v2486_v50 = vld [vmem:[%s3105_s23 + $0x58] sm:$0xff]  }
 0x41a   : > { %2280 = vmatmul.mubr.msk.bf16.vlgmr.msra.gmra.mxu0 %vm936_vm2, %v1381_v27  ;;  %v2487_v51 = vld [vmem:[%s3105_s23 + $0x18] sm:$0xff]   ;;  %v2488_v52 = vld [vmem:[%s3105_s23 + $0x50] sm:$0xff]   ;;  %v2490_v60 = vld [vmem:[%s3105_s23 + $0x48] sm:$0xff]  }
 0x41b   : > { %1541 = vmatpush1.bf16.msra.mxu1 %v2462_v29  ;;  %2228 = vmatpush3.bf16.msra.mxu0 %v2479_v43  ;;  %v2489_v53 = vld [vmem:[%s3105_s23 + $0x10] sm:$0xff]   ;;  %v2491_v61 = vld [vmem:[%s3105_s23 + $0x8] sm:$0xff]   ;;  %v2492_v62 = vld [vmem:[%s3105_s23 + $0x40] sm:$0xff]  }
 0x41c   : > { %1542 = vmatprep.subr.bf16.mxu1 %v2463_v32  ;;  %2229 = vmatprep.subr.bf16.mxu0 %v2480_v44  ;;  %v2493_v63 = vld [vmem:[%s3105_s23] sm:$0xff]   ;;  %v1444_v0 = vld [vmem:[%s3141_s28] sm:$0x3] }
 0x41d   : > { %v1449_v2 = vrot.slane %v1444_v0, %v1032_v11  ;;  %v2161_v11 = vld [vmem:[%s803_s29] ss:$0 sm:$0xff] }
 0x41f   : > { %1543 = vmatpush1.bf16.msra.mxu1 %v2465_v40  ;;  %2230 = vmatpush3.bf16.msra.mxu0 %v2481_v45 }
 0x420   : > { %1544 = vmatprep.subr.bf16.mxu1 %v2466_v30  ;;  %2231 = vmatprep.subr.bf16.mxu0 %v2482_v46 }
 0x423   : > { %1545 = vmatpush1.bf16.msra.mxu1 %v2468_v31  ;;  %2232 = vmatpush3.bf16.msra.mxu0 %v2483_v47 }
 0x424   : > { %1546 = vmatprep.subr.bf16.mxu1 %v2469_v33  ;;  %2233 = vmatprep.subr.bf16.mxu0 %v2484_v48 }
 0x427   : > { %1547 = vmatpush1.bf16.msra.mxu1 %v2471_v34  ;;  %2234 = vmatpush3.bf16.msra.mxu0 %v2485_v49 }
 0x428   : > { %1548 = vmatprep.subr.bf16.mxu1 %v2472_v35  ;;  %2235 = vmatprep.subr.bf16.mxu0 %v2486_v50 }
 0x42b   : > { %1549 = vmatpush1.bf16.msra.mxu1 %v2474_v37  ;;  %2236 = vmatpush3.bf16.msra.mxu0 %v2487_v51 }
 0x42c   : > { %1550 = vmatprep.subr.bf16.mxu1 %v2475_v38  ;;  %2237 = vmatprep.subr.bf16.mxu0 %v2488_v52 }
 0x42f   : > { %1551 = vmatpush1.bf16.msra.mxu1 %v2477_v39  ;;  %2238 = vmatpush3.bf16.msra.mxu0 %v2489_v53 }
 0x430   : > { %2239 = vmatprep.subr.bf16.mxu0 %v2490_v60 }
 0x433   : > { %2240 = vmatpush3.bf16.msra.mxu0 %v2491_v61 }
 0x434   : > { %2241 = vmatprep.subr.bf16.mxu0 %v2492_v62 }
 0x437   : > { %2242 = vmatpush3.bf16.msra.mxu0 %v2493_v63 }
 0x4da   : > { %v1421_v54 = vpop.f32.mrf.mxu0 }
 0x4db   : > { %v1422_v55 = vadd.f32 %v1421_v54, %v3160_v5  ;;  %v1453_v5 = vrot.slane %v1444_v0, %v1036_v24 }
 0x4dc   : > { %v2281_v56 = vpop.f32.mrf.mxu0 }
 0x4dd   : > { %v1443_v57 = vpack.c.bf16 %v1422_v55, %v1422_v55 }
 0x4de   : > { %v1424_v58 = vpop.f32.mrf.mxu0 }
 0x4df   : > { %1569 = vmatmul.mubr.bf16.vlgmr.msra.gmra.mxu1 %v1443_v57 }
 0x4e0   : > { %v2282_v59 = vpop.f32.mrf.mxu0 }
 0x59f   : > { %v1570_v3 = vpop.f32.mrf.mxu1 }
 0x5a0   : > { %v1571_v4 = vadd.f32 %v1570_v3, %v1449_v2 }
 0x5a1   : > { %v1572_v7 = vpop.f32.mrf.mxu1 }
 0x5a2   : > { %v1573_v8 = vadd.f32 %v1572_v7, %v1453_v5  ;;  %v1577_v9 = vmax.f32 %v1571_v4, 0.0 }
 0x5a3   : > { %v1574_v12 = vpop.f32.mrf.mxu1 }
 0x5a4   : > { %v1578_v13 = vmax.f32 %v1573_v8, 0.0  ;;  %v1611_v17 = vpack.c.bf16 %v1577_v9, %v1577_v9 }
 0x5a5   : > { %v1575_v15 = vpop.f32.mrf.mxu1 }
 0x5a6   : > { %v1612_v16 = vpack.c.bf16 %v1578_v13, %v1578_v13 }
 0x5a8   : > { %1748 = vmatprep.mubr.bf16.mxu0 %v1612_v16 }
 0x5a9   : > { %1749 = vmatmul.mubr.bf16.vlgmr.msra.gmra.mxu0 %v1611_v17 }
 0x669   : > { %v2243_v18 = vpop.f32.mrf.mxu0 }
 0x66b   : > { %v2244_v23 = vpop.f32.mrf.mxu0 }
 0x66c   : > { %v2245_v24 = vadd.f32 %v2244_v23, %v2243_v18 }
 0x66d   : > { %v2246_v19 = vpop.f32.mrf.mxu0 }
 0x66e   : > { %v1751_v20 = vadd.f32 %v2245_v24, %v2161_v11 }
 0x66f   : > { %v2247_v21 = vpop.f32.mrf.mxu0 }
 0x670   : > { %v1756_v22 = vmax.f32 %v1751_v20, 0.0 }
 0x672   : > { %1757 = vst [vmem:[#allocation3] sm:$0x3] %v1756_v22 }
 0x673 PF: > { %p2178_p5 = scmp.ne.s32.totalorder %s2848_s30, 2 }
 0x674   : > { %s3498_s22 = sld [smem:[#allocation26_spill]] (!%p2178_p5) }
 0x675   : > { %1760 = sbr.rel (%p2178_p5) target bundleno = 2063 (0x80f), region = 116  ;;  %s3499_s0 = sld [smem:[#allocation34_spill]] (!%p2178_p5) }
 0x676   : > { %s3501_s21 = sld [smem:[#allocation25_spill]] (!%p2178_p5) }
 0x677   : > { %s3502_s6 = sld [smem:[#allocation35_spill]] (!%p2178_p5) }
 0x67a   : > { %v1763_v25 = vpack.c.bf16 %v3254_v14, %v3252_v10  ;;  %v1807_v28 = vld [vmem:[%s3498_s22] sm:$0x3]  ;;  %v2720_v36 = vmov 0.0   ;;  %vm2721_vm4 = vmmov 0   ;;  %v1762_v10 = vpack.c.bf16 %v3250_v6, %v3248_v1 }
 0x67b   : > { %2283 = vmatprep.subr.bf16.mxu0 %v2720_v36  ;;  %2287 = vmatprep.mubr.msk.bf16.mxu0 %vm2721_vm4, %v2720_v36  ;;  %s3500_s16 = smov %s3499_s0  ;;  %v1828_v26 = vld [vmem:[%s3499_s0 + $0x70] sm:$0xff]  ;;  %v2722_v14 = vmov 0   ;;  %vm1886_vm5 = vcmask 25600  }
 0x67c   : > { %v1829_v27 = vld [vmem:[%s3500_s16 + $0x78] sm:$0xff]  ;;  %2284 = vmatpush3.bf16.msra.mxu0 %v1763_v25  ;;  %2494 = vset.pattern.permute.xlu0 %v2722_v14  ;;  %v1826_v32 = vld [vmem:[%s3500_s16 + $0x60] sm:$0xff]  ;;  %v1827_v40 = vld [vmem:[%s3500_s16 + $0x68] sm:$0xff] }
 0x67d   : > { %v1838_v29 = vpack.c.bf16 %v1829_v27, %v1828_v26  ;;  %2285 = vmatprep.subr.bf16.mxu0 %v2720_v36  ;;  %1810 = vperm.xlu0 %2494, %v1807_v28   ;;  %v1837_v30 = vpack.c.bf16 %v1827_v40, %v1826_v32  ;;  %v1761_v1 = vld [vmem:[%s3501_s21] sm:$0x1]  ;;  %v1824_v6 = vld [vmem:[%s3500_s16 + $0x50] sm:$0xff]  ;;  %v1825_v31 = vld [vmem:[%s3500_s16 + $0x58] sm:$0xff] }
 0x67e   : > { %2291 = vmatprep.subr.bf16.mxu1 %v2720_v36  ;;  %2307 = vmatprep.mubr.msk.bf16.mxu1 %vm2721_vm4, %v2720_v36  ;;  %v1836_v33 = vpack.c.bf16 %v1825_v31, %v1824_v6  ;;  %v1822_v34 = vld [vmem:[%s3500_s16 + $0x40] sm:$0xff]  ;;  %v1823_v35 = vld [vmem:[%s3500_s16 + $0x48] sm:$0xff]  ;;  %v1820_v38 = vld [vmem:[%s3500_s16 + $0x30] sm:$0xff] }
 0x67f   : > { %2292 = vmatpush3.bf16.msra.mxu1 %v1838_v29  ;;  %v1835_v37 = vpack.c.bf16 %v1823_v35, %v1822_v34  ;;  %v1821_v39 = vld [vmem:[%s3500_s16 + $0x38] sm:$0xff]  ;;  %v1818_v42 = vld [vmem:[%s3500_s16 + $0x20] sm:$0xff]  ;;  %v1819_v43 = vld [vmem:[%s3500_s16 + $0x28] sm:$0xff] }
 0x680   : > { %2286 = vmatpush3.bf16.msra.mxu0 %v1762_v10  ;;  %2293 = vmatprep.subr.bf16.mxu1 %v2720_v36  ;;  %v1834_v41 = vpack.c.bf16 %v1821_v39, %v1820_v38  ;;  %v1833_v44 = vpack.c.bf16 %v1819_v43, %v1818_v42  ;;  %v1816_v45 = vld [vmem:[%s3500_s16 + $0x10] sm:$0xff]  ;;  %v1817_v46 = vld [vmem:[%s3500_s16 + $0x18] sm:$0xff]  ;;  %v1814_v48 = vld [vmem:[%s3500_s16] sm:$0xff] }
 0x681   : > { %v1832_v47 = vpack.c.bf16 %v1817_v46, %v1816_v45  ;;  %v1815_v49 = vld [vmem:[%s3500_s16 + $0x8] sm:$0xff]  ;;  %v2180_v58 = vld [vmem:[%s3502_s6] ss:$0 sm:$0xff] }
 0x682   : > { %v1831_v50 = vpack.c.bf16 %v1815_v49, %v1814_v48 }
 0x683   : > { %2288 = vmatmul.mubr.msk.bf16.vlgmr.msra.gmra.mxu0 %vm936_vm2, %v1761_v1  ;;  %2294 = vmatpush3.bf16.msra.mxu1 %v1837_v30 }
 0x684   : > { %2295 = vmatprep.subr.bf16.mxu1 %v2720_v36 }
 0x687   : > { %2296 = vmatpush3.bf16.msra.mxu1 %v1836_v33 }
 0x688   : > { %2297 = vmatprep.subr.bf16.mxu1 %v2720_v36 }
 0x68b   : > { %2298 = vmatpush3.bf16.msra.mxu1 %v1835_v37 }
 0x68c   : > { %2299 = vmatprep.subr.bf16.mxu1 %v2720_v36 }
 0x68f   : > { %2300 = vmatpush3.bf16.msra.mxu1 %v1834_v41 }
 0x690   : > { %2301 = vmatprep.subr.bf16.mxu1 %v2720_v36 }
 0x693   : > { %2302 = vmatpush3.bf16.msra.mxu1 %v1833_v44 }
 0x694   : > { %2303 = vmatprep.subr.bf16.mxu1 %v2720_v36 }
 0x697   : > { %2304 = vmatpush3.bf16.msra.mxu1 %v1832_v47 }
 0x698   : > { %2305 = vmatprep.subr.bf16.mxu1 %v2720_v36 }
 0x69b   : > { %2306 = vmatpush3.bf16.msra.mxu1 %v1831_v50 }
 0x6f8   : > { %v1811_v51 = vpop.permute.xlu0 %1810 }
 0x743   : > { %v1801_v52 = vpop.f32.mrf.mxu0 }
 0x744   : > { %v1813_v53 = vmul.f32 %v1811_v51, %v1801_v52 }
 0x745   : > { %v2289_v54 = vpop.f32.mrf.mxu0 }
 0x746   : > { %v1830_v55 = vpack.c.bf16 %v1813_v53, %v1813_v53 }
 0x747   : > { %v1804_v56 = vpop.f32.mrf.mxu0 }
 0x748   : > { %2308 = vmatmul.mubr.bf16.vlgmr.msra.gmra.mxu1 %v1830_v55 }
 0x749   : > { %v2290_v57 = vpop.f32.mrf.mxu0 }
 0x808   : > { %v1880_v59 = vpop.f32.mrf.mxu1 }
 0x809   : > { %v1881_v60 = vadd.f32 %v2180_v58, %v1880_v59 }
 0x80a   : > { %v2309_v61 = vpop.f32.mrf.mxu1 }
 0x80b   : > { %1887 = vst.msk [vmem:[#allocation12] sm:$0x3] %vm1886_vm5, %v1881_v60 }
 0x80c   : > { %v1883_v62 = vpop.f32.mrf.mxu1 }
 0x80e   : > { %v2310_v63 = vpop.f32.mrf.mxu1 }
 0x80f PF: > { %s2723_s22 = smov [#allocation12]  }
 0x810   : > { %s1895_s7 = sshll.u32 %s2723_s22, 4  ;;  %s1896_s7 = int_to_ptr.vmem [resolvable:$true] %s1895_s7 }
 0x811   : > { %s2607_s29 = scalar_lea.vmem %s1896_s7, 32  ;;  %p2614_p1 = scmp.lt.s32.totalorder %s1896_s7, %s1896_s7 }
 0x812   : > { %p2608_p8 = scmp.ne.s32.totalorder %s1896_s7, %s2607_s29  ;;  %p2615_p2 = scmp.lt.s32.totalorder %s2607_s29, %s2607_s29 }
 0x814   : > { %p2609_p0 = pnand %p2608_p8, %p2143_p13  ;;  %p2616_p10 = por %p2615_p2, %p2614_p1 }
 0x816   : > { %p2610_p7 = pneg %p2609_p0 }
 0x818   : > { %p2617_p9 = pnand %p2616_p10, %p2610_p7 }
 0x81a   : > { %2620 = shalt.err (!%p2617_p9)
}
 0x81b   : > { %s3503_s24 = sld [smem:[#allocation36_spill]] }
 0x821   : > { %2321 = dma.vmem_to_hbm [thread:$0]  (%p2143_p13), %s1896_s7, 32, %s3503_s24, [#allocation6]  }
 0x822   : > { %2676 = dma.done.wait (%p2143_p13), [#allocation6], 32  }
 0x823   : > { %2678 = vsyncadd (%p2143_p13), [#allocation6], 4294967264 }
 0x824 PF: > { %s3504_s20 = sld [smem:[#allocation21_spill]]  ;;  %p34_p3 = scmp.ge.s32.totalorder %s2851_s18, 5  }
 0x825   : > { %s3505_s27 = sld [smem:[#allocation18_spill]]  ;;  %s3508_s24 = smov %s2685_s25 }
 0x826   : > { %s3506_s28 = sld [smem:[#allocation19_spill]]  ;;  %s3509_s25 = smov %s2689_s26 }
 0x827   : > { %s3507_s29 = sld [smem:[#allocation20_spill]]  ;;  %s3511_s0 = smov %s2851_s18 }
 0x828   :  { %36 = sbr.rel (!%p34_p3) target bundleno = 26 (0x1a), region = 192 }
 0x82a   : > { %s3510_s26 = smov %s3504_s20 }
 0x82d   :  { %1908 = vsyncpa [#allocation5], 1 }
 0x82e   :  { %1910 = vsyncpa [#allocation5 + $0x1], 1 }
 0x82f   :  { %1911 = vsyncpa [#allocation8], 1 }
 0x830   :  { %1913 = vsyncpa [#allocation8 + $0x1], 1 }
 0x831   :  { %1914 = vsyncpa [#allocation11], 1 }
 0x832   :  { %1916 = vsyncpa [#allocation11 + $0x1], 1 }
 0x833   :  { %1917 = vsyncpa [#allocation6], 1 }
 0x834   :  { %1919 = vsyncpa [#allocation6 + $0x1], 1 }

</bundles_post_ra>
